<compile_context>
chip_gen: v7x
topology: tpu7x:2x2x1
jax: 0.10.0
libtpu: 0.0.40
codegen_flags: <defaults>
</compile_context>

<pallas_src>
import functools

import jax
import jax.numpy as jnp
import numpy as np
from jax import lax
from jax.experimental import pallas as pl
from jax.experimental.pallas import tpu as pltpu


def _round_up(x, m):
    return ((x + m - 1) // m) * m


def _pick_tile(b_pad, cap):
    """Largest power-of-two-times-128 tile <= cap that divides b_pad."""
    t = cap
    while b_pad % t != 0:
        t //= 2
    return t


def _scl_kernel(q_ref, k_ref, lab_q_ref, lab_k_ref, out_ref,
                pos_max_s, pos_score_s, neg_max_s, neg_score_s,
                *, valid_b, tm, tn, hn_lambda, temperature, hard_cutoff):
    i = pl.program_id(0)                      # query-row tile (parallel)
    j = pl.program_id(1)                      # key-column tile (reduction)

    # --- normalize (F.normalize, eps=1e-12); cast from native dtype in-kernel ---
    q = q_ref[...].astype(jnp.float32)        # (TM, D) queries
    k = k_ref[...].astype(jnp.float32)        # (TN, D) keys
    qn = q / jnp.maximum(jnp.sqrt(jnp.sum(q * q, axis=1, keepdims=True)), 1e-12)
    kn = k / jnp.maximum(jnp.sqrt(jnp.sum(k * k, axis=1, keepdims=True)), 1e-12)

    # dist_t[n, m] = cosine similarity between key n and query m.  Keys on the
    # sublane axis / queries on the lane axis => all per-query reductions below
    # produce lane-dense (1, TM) rows.  f32 MXU operands keep the clamp / tie
    # semantics exact w.r.t. the reference.
    dist_t = lax.dot_general(kn, qn, (((1,), (1,)), ((), ())),
                             preferred_element_type=jnp.float32)   # (TN, TM)

    key_g = j * tn + lax.broadcasted_iota(jnp.int32, (tn, tm), 0)  # global key idx
    row_g = i * tm + lax.broadcasted_iota(jnp.int32, (tn, tm), 1)  # global query idx
    diag = key_g == row_g
    key_valid = key_g < valid_b               # mask padded key columns
    dist_t = jnp.where(diag | (~key_valid), -1.0, dist_t)
    same = (lab_k_ref[...] == lab_q_ref[...]) & (~diag) & key_valid

    big_idx = jnp.int32(2 ** 30)

    # --- mine easy positives (max over same-label keys, clamp >0.9999 -> 1) ---
    pos_m = jnp.where(same, dist_t, -1.0)
    pos_m = jnp.where(pos_m > 0.9999, 1.0, pos_m)
    lpos_max = jnp.max(pos_m, axis=0, keepdims=True)                     # (1, TM)
    lpos_idx = jnp.min(jnp.where(pos_m == lpos_max, key_g, big_idx),
                       axis=0, keepdims=True)                            # first argmax
    lpos_score = jnp.sum(jnp.where(key_g == lpos_idx, dist_t, 0.0),
                         axis=0, keepdims=True)                          # dist @ argmax

    # --- mine hard negatives ---
    neg_m = jnp.where(same, -1.0, dist_t)
    lneg_max = jnp.max(neg_m, axis=0, keepdims=True)
    lneg_idx = jnp.min(jnp.where(neg_m == lneg_max, key_g, big_idx),
                       axis=0, keepdims=True)
    lneg_score = jnp.sum(jnp.where(key_g == lneg_idx, dist_t, 0.0),
                         axis=0, keepdims=True)

    # --- online merge across key tiles (earlier tile wins ties => global
    #     first-index argmax rule is preserved) ---
    @pl.when(j == 0)
    def _init():
        pos_max_s[...] = lpos_max
        pos_score_s[...] = lpos_score
        neg_max_s[...] = lneg_max
        neg_score_s[...] = lneg_score

    @pl.when(j > 0)
    def _merge():
        take_p = lpos_max > pos_max_s[...]
        pos_score_s[...] = jnp.where(take_p, lpos_score, pos_score_s[...])
        pos_max_s[...] = jnp.where(take_p, lpos_max, pos_max_s[...])
        take_n = lneg_max > neg_max_s[...]
        neg_score_s[...] = jnp.where(take_n, lneg_score, neg_score_s[...])
        neg_max_s[...] = jnp.where(take_n, lneg_max, neg_max_s[...])

    # --- finalize on the last key tile: per-query loss terms, lane-dense out ---
    @pl.when(j == pl.num_programs(1) - 1)
    def _finalize():
        pos_max = pos_max_s[...]
        neg_max = neg_max_s[...]
        easy = pos_score_s[...]
        hard = neg_score_s[...]
        combined = ((pos_max > -1.0) & (pos_max < 1.0) &
                    (neg_max > -1.0) & (neg_max < 1.0))
        hard_mask = ((hard > easy) | (hard > hard_cutoff)) & combined
        easy_mask = (hard < easy) & (hard < hard_cutoff) & combined
        e = easy / temperature
        h = hard / temperature
        m = jnp.maximum(e, h)
        neg_log_p0 = (m + jnp.log(jnp.exp(e - m) + jnp.exp(h - m))) - e
        loss_row = (jnp.where(hard_mask, hn_lambda * hard, 0.0) +
                    jnp.where(easy_mask, neg_log_p0, 0.0))
        cnt_row = hard_mask.astype(jnp.float32) + easy_mask.astype(jnp.float32)
        # lane-dense (4, TM) output block: rows = easy, hard, loss-term, count
        out_ref[0:1, :] = easy
        out_ref[1:2, :] = hard
        out_ref[2:3, :] = loss_row
        out_ref[3:4, :] = cnt_row


def selectively_contrastive_loss(embeddings, labels, *, hn_lambda=1.0,
                                 temperature=0.1, hard_cutoff=0.8):
    """Pallas TPU forward of the contrastive loss (key_embeddings=None path).

    embeddings: (B, D) float32 / bfloat16
    labels:     (B,)   integer
    returns (loss scalar, triplets (B, 2))
    """
    B, D = embeddings.shape
    B_pad = _round_up(B, 128)
    TM = _pick_tile(B_pad, 256)               # query tile (lane width of outputs)
    TN = _pick_tile(B_pad, 512)               # key tile (streamed reduction)
    n_i = B_pad // TM
    n_j = B_pad // TN

    emb = embeddings                           # native dtype; cast happens in-kernel
    lab = labels.astype(jnp.int32)
    if B_pad != B:
        emb = jnp.pad(emb, ((0, B_pad - B), (0, 0)))
        lab = jnp.pad(lab, (0, B_pad - B))
    lab_q = lab.reshape(1, B_pad)              # query labels (lanes)
    lab_k = lab.reshape(B_pad, 1)              # key labels (sublanes)

    kernel = functools.partial(
        _scl_kernel, valid_b=B, tm=TM, tn=TN, hn_lambda=hn_lambda,
        temperature=temperature, hard_cutoff=hard_cutoff)

    key_emb_spec = pl.BlockSpec((TN, D), lambda i, j: (j, 0))
    if n_j > 2:
        # 3-deep buffering on the streamed key tiles hides per-step pipeline
        # startup when many short key-tile DMAs are issued (perf review).
        try:
            key_emb_spec = pl.BlockSpec((TN, D), lambda i, j: (j, 0),
                                        pipeline_mode=pl.Buffered(3))
        except TypeError:  # older jax without pipeline_mode: keep default depth
            pass

    out = pl.pallas_call(
        kernel,
        out_shape=jax.ShapeDtypeStruct((4, B_pad), jnp.float32),
        grid=(n_i, n_j),
        in_specs=[
            pl.BlockSpec((TM, D), lambda i, j: (i, 0)),   # query embeddings
            key_emb_spec,                                 # key embeddings (streamed)
            pl.BlockSpec((1, TM), lambda i, j: (0, i)),   # query labels
            pl.BlockSpec((TN, 1), lambda i, j: (j, 0)),   # key labels
        ],
        out_specs=pl.BlockSpec((4, TM), lambda i, j: (0, i)),
        scratch_shapes=[pltpu.VMEM((1, TM), jnp.float32) for _ in range(4)],
        compiler_params=pltpu.CompilerParams(
            dimension_semantics=("parallel", "arbitrary"),
            vmem_limit_bytes=32 * 1024 * 1024),
    )(emb, emb, lab_q, lab_k)

    triplets = out[0:2, :B].T                              # (B, 2)
    n_trip = jnp.sum(out[3, :B])
    loss = jnp.sum(out[2, :B]) / jnp.maximum(n_trip, 1.0)  # n_trip==0 -> divide by 1
    return loss, triplets


# --- pure-JAX reference (mirrors the PyTorch semantics) for verification ---
def _reference(embeddings, labels, hn_lambda=1.0, temperature=0.1, hard_cutoff=0.8):
    x = embeddings.astype(jnp.float32)
    B = x.shape[0]
    xn = x / jnp.maximum(jnp.linalg.norm(x, axis=1, keepdims=True), 1e-12)
    dist = xn @ xn.T
    dist = dist.at[jnp.arange(B), jnp.arange(B)].set(-1.0)
    same = (labels[:, None] == labels[None, :]) & (~jnp.eye(B, dtype=bool))

    pos_m = jnp.where(same, dist, -1.0)
    pos_m = jnp.where(pos_m > 0.9999, 1.0, pos_m)
    pos_max = pos_m.max(axis=1)
    pos_idx = jnp.argmax(pos_m, axis=1)
    pos_valid = (pos_max > -1.0) & (pos_max < 1.0)
    easy = dist[jnp.arange(B), pos_idx]

    neg_m = jnp.where(same, -1.0, dist)
    neg_max = neg_m.max(axis=1)
    neg_idx = jnp.argmax(neg_m, axis=1)
    neg_valid = (neg_max > -1.0) & (neg_max < 1.0)
    hard = dist[jnp.arange(B), neg_idx]

    combined = pos_valid & neg_valid
    hard_mask = ((hard > easy) | (hard > hard_cutoff)) & combined
    easy_mask = (hard < easy) & (hard < hard_cutoff) & combined
    triplets = jnp.stack([easy, hard], axis=1)

    hard_loss = jnp.sum(jnp.where(hard_mask, hard, 0.0))
    logits = triplets / temperature
    neg_log_p0 = -jax.nn.log_softmax(logits, axis=1)[:, 0]
    easy_loss = jnp.sum(jnp.where(easy_mask, neg_log_p0, 0.0))
    n_trip = hard_mask.sum() + easy_mask.sum()
    n_trip = jnp.where(n_trip == 0, 1, n_trip).astype(jnp.float32)
    loss = (hn_lambda * hard_loss + easy_loss) / n_trip
    return loss, triplets


if __name__ == "__main__":
    key = jax.random.PRNGKey(0)
    k1, k2, k3, k4 = jax.random.split(key, 4)

    # Small case (single tile after padding to 128).
    B, D = 8, 32
    emb = jax.random.normal(k1, (B, D), dtype=jnp.float32)
    lab = jax.random.randint(k2, (B,), 0, 3, dtype=jnp.int32)
    loss, trip = jax.block_until_ready(selectively_contrastive_loss(emb, lab))
    ref_loss, ref_trip = _reference(emb, lab)
    np.testing.assert_allclose(np.asarray(loss), np.asarray(ref_loss),
                               rtol=1e-5, atol=1e-5)
    np.testing.assert_allclose(np.asarray(trip), np.asarray(ref_trip),
                               rtol=1e-5, atol=1e-5)

    # Larger, non-multiple-of-128 case: exercises padding, the multi-tile
    # online merge, and the deeper-buffered key stream.
    B2, D2 = 300, 64
    emb2 = jax.random.normal(k3, (B2, D2), dtype=jnp.float32)
    lab2 = jax.random.randint(k4, (B2,), 0, 7, dtype=jnp.int32)
    loss2, trip2 = jax.block_until_ready(selectively_contrastive_loss(emb2, lab2))
    ref_loss2, ref_trip2 = _reference(emb2, lab2)
    np.testing.assert_allclose(np.asarray(loss2), np.asarray(ref_loss2),
                               rtol=1e-5, atol=1e-5)
    np.testing.assert_allclose(np.asarray(trip2), np.asarray(ref_trip2),
                               rtol=1e-5, atol=1e-5)

    print("KERNEL_OK")
</pallas_src>

<mosaic_0001>
module attributes {stable_mosaic.version = 11 : i64} {
  func.func @_scl_kernel(%arg0: i32, %arg1: i32, %arg2: memref<128x32xf32, #tpu.memory_space<vmem>>, %arg3: memref<128x32xf32, #tpu.memory_space<vmem>>, %arg4: memref<1x128xi32, #tpu.memory_space<vmem>>, %arg5: memref<128x1xi32, #tpu.memory_space<vmem>>, %arg6: memref<4x128xf32, #tpu.memory_space<vmem>>, %arg7: memref<1x128xf32, #tpu.memory_space<vmem>>, %arg8: memref<1x128xf32, #tpu.memory_space<vmem>>, %arg9: memref<1x128xf32, #tpu.memory_space<vmem>>, %arg10: memref<1x128xf32, #tpu.memory_space<vmem>>) attributes {dimension_semantics = [#tpu.dimension_semantics<parallel>, #tpu.dimension_semantics<arbitrary>], iteration_bounds = array<i64: 1, 1>, scalar_prefetch = 0 : i64, scratch_operands = 4 : i64, tpu.core_type = #tpu.core_type<tc>, window_params = [{transform_indices = @transform_0, window_bounds = array<i64: 128, 32>}, {transform_indices = @transform_1, window_bounds = array<i64: 128, 32>}, {transform_indices = @transform_2, window_bounds = array<i64: 1, 128>}, {transform_indices = @transform_3, window_bounds = array<i64: 128, 1>}, {transform_indices = @transform_4, window_bounds = array<i64: 4, 128>}]} {
    %c0 = arith.constant 0 : index
    %c0_0 = arith.constant 0 : index
    %0 = vector.load %arg2[%c0, %c0_0] : memref<128x32xf32, #tpu.memory_space<vmem>>, vector<128x32xf32>
    %c0_1 = arith.constant 0 : index
    %c0_2 = arith.constant 0 : index
    %1 = vector.load %arg3[%c0_1, %c0_2] : memref<128x32xf32, #tpu.memory_space<vmem>>, vector<128x32xf32>
    %2 = arith.mulf %0, %0 : vector<128x32xf32>
    %cst = arith.constant dense<0.000000e+00> : vector<128xf32>
    %3 = vector.multi_reduction <add>, %2, %cst [1] : vector<128x32xf32> to vector<128xf32>
    %4 = vector.shape_cast %3 : vector<128xf32> to vector<128x1xf32>
    %5 = math.sqrt %4 : vector<128x1xf32>
    %cst_3 = arith.constant 9.99999996E-13 : f32
    %6 = vector.broadcast %cst_3 : f32 to vector<128x1xf32>
    %7 = arith.maximumf %5, %6 : vector<128x1xf32>
    %8 = vector.broadcast %7 : vector<128x1xf32> to vector<128x32xf32>
    %9 = arith.divf %0, %8 : vector<128x32xf32>
    %10 = arith.mulf %1, %1 : vector<128x32xf32>
    %cst_4 = arith.constant dense<0.000000e+00> : vector<128xf32>
    %11 = vector.multi_reduction <add>, %10, %cst_4 [1] : vector<128x32xf32> to vector<128xf32>
    %12 = vector.shape_cast %11 : vector<128xf32> to vector<128x1xf32>
    %13 = math.sqrt %12 : vector<128x1xf32>
    %cst_5 = arith.constant 9.99999996E-13 : f32
    %14 = vector.broadcast %cst_5 : f32 to vector<128x1xf32>
    %15 = arith.maximumf %13, %14 : vector<128x1xf32>
    %16 = vector.broadcast %15 : vector<128x1xf32> to vector<128x32xf32>
    %17 = arith.divf %1, %16 : vector<128x32xf32>
    %cst_6 = arith.constant dense<0.000000e+00> : vector<128x128xf32>
    %18 = tpu.matmul %17, %9, %cst_6 {dimension_numbers = #tpu.dot_dimension_numbers<[1], [1], [0], [0], [0, 0, 1, 0], [], []>} : vector<128x32xf32>, vector<128x32xf32>, vector<128x128xf32> -> vector<128x128xf32>
    %c128_i32 = arith.constant 128 : i32
    %19 = arith.muli %arg1, %c128_i32 : i32
    %20 = tpu.iota {dimensions = array<i32: 0>} : vector<128x128xi32>
    %21 = vector.broadcast %19 : i32 to vector<128x128xi32>
    %22 = arith.addi %21, %20 : vector<128x128xi32>
    %c128_i32_7 = arith.constant 128 : i32
    %23 = arith.muli %arg0, %c128_i32_7 : i32
    %24 = tpu.iota {dimensions = array<i32: 1>} : vector<128x128xi32>
    %25 = vector.broadcast %23 : i32 to vector<128x128xi32>
    %26 = arith.addi %25, %24 : vector<128x128xi32>
    %27 = arith.cmpi eq, %22, %26 : vector<128x128xi32>
    %c8_i32 = arith.constant 8 : i32
    %28 = vector.broadcast %c8_i32 : i32 to vector<128x128xi32>
    %29 = arith.cmpi slt, %22, %28 : vector<128x128xi32>
    %cst_8 = arith.constant dense<true> : vector<128x128xi1>
    %30 = arith.xori %29, %cst_8 : vector<128x128xi1>
    %31 = arith.ori %27, %30 : vector<128x128xi1>
    %cst_9 = arith.constant -1.000000e+00 : f32
    %32 = vector.broadcast %cst_9 : f32 to vector<128x128xf32>
    %33 = arith.select %31, %32, %18 : vector<128x128xi1>, vector<128x128xf32>
    %c0_10 = arith.constant 0 : index
    %c0_11 = arith.constant 0 : index
    %34 = vector.load %arg5[%c0_10, %c0_11] : memref<128x1xi32, #tpu.memory_space<vmem>>, vector<128x1xi32>
    %c0_12 = arith.constant 0 : index
    %c0_13 = arith.constant 0 : index
    %35 = vector.load %arg4[%c0_12, %c0_13] : memref<1x128xi32, #tpu.memory_space<vmem>>, vector<1x128xi32>
    %36 = vector.broadcast %34 : vector<128x1xi32> to vector<128x128xi32>
    %37 = vector.broadcast %35 : vector<1x128xi32> to vector<128x128xi32>
    %38 = arith.cmpi eq, %36, %37 : vector<128x128xi32>
    %cst_14 = arith.constant dense<true> : vector<128x128xi1>
    %39 = arith.xori %27, %cst_14 : vector<128x128xi1>
    %40 = arith.andi %38, %39 : vector<128x128xi1>
    %41 = arith.andi %40, %29 : vector<128x128xi1>
    %cst_15 = arith.constant -1.000000e+00 : f32
    %42 = vector.broadcast %cst_15 : f32 to vector<128x128xf32>
    %43 = arith.select %41, %33, %42 : vector<128x128xi1>, vector<128x128xf32>
    %cst_16 = arith.constant 0.999899983 : f32
    %44 = vector.broadcast %cst_16 : f32 to vector<128x128xf32>
    %45 = arith.cmpf ogt, %43, %44 : vector<128x128xf32>
    %cst_17 = arith.constant 1.000000e+00 : f32
    %46 = vector.broadcast %cst_17 : f32 to vector<128x128xf32>
    %47 = arith.select %45, %46, %43 : vector<128x128xi1>, vector<128x128xf32>
    %cst_18 = arith.constant dense<0xFF800000> : vector<128xf32>
    %48 = vector.multi_reduction <maximumf>, %47, %cst_18 [0] : vector<128x128xf32> to vector<128xf32>
    %49 = vector.shape_cast %48 : vector<128xf32> to vector<1x128xf32>
    %50 = vector.broadcast %49 : vector<1x128xf32> to vector<128x128xf32>
    %51 = arith.cmpf oeq, %47, %50 : vector<128x128xf32>
    %c1073741824_i32 = arith.constant 1073741824 : i32
    %52 = vector.broadcast %c1073741824_i32 : i32 to vector<128x128xi32>
    %53 = arith.select %51, %22, %52 : vector<128x128xi1>, vector<128x128xi32>
    %cst_19 = arith.constant dense<2147483647> : vector<128xi32>
    %54 = vector.multi_reduction <minsi>, %53, %cst_19 [0] : vector<128x128xi32> to vector<128xi32>
    %55 = vector.shape_cast %54 : vector<128xi32> to vector<1x128xi32>
    %56 = vector.broadcast %55 : vector<1x128xi32> to vector<128x128xi32>
    %57 = arith.cmpi eq, %22, %56 : vector<128x128xi32>
    %cst_20 = arith.constant 0.000000e+00 : f32
    %58 = vector.broadcast %cst_20 : f32 to vector<128x128xf32>
    %59 = arith.select %57, %33, %58 : vector<128x128xi1>, vector<128x128xf32>
    %cst_21 = arith.constant dense<0.000000e+00> : vector<128xf32>
    %60 = vector.multi_reduction <add>, %59, %cst_21 [0] : vector<128x128xf32> to vector<128xf32>
    %61 = vector.shape_cast %60 : vector<128xf32> to vector<1x128xf32>
    %cst_22 = arith.constant -1.000000e+00 : f32
    %62 = vector.broadcast %cst_22 : f32 to vector<128x128xf32>
    %63 = arith.select %41, %62, %33 : vector<128x128xi1>, vector<128x128xf32>
    %cst_23 = arith.constant dense<0xFF800000> : vector<128xf32>
    %64 = vector.multi_reduction <maximumf>, %63, %cst_23 [0] : vector<128x128xf32> to vector<128xf32>
    %65 = vector.shape_cast %64 : vector<128xf32> to vector<1x128xf32>
    %66 = vector.broadcast %65 : vector<1x128xf32> to vector<128x128xf32>
    %67 = arith.cmpf oeq, %63, %66 : vector<128x128xf32>
    %c1073741824_i32_24 = arith.constant 1073741824 : i32
    %68 = vector.broadcast %c1073741824_i32_24 : i32 to vector<128x128xi32>
    %69 = arith.select %67, %22, %68 : vector<128x128xi1>, vector<128x128xi32>
    %cst_25 = arith.constant dense<2147483647> : vector<128xi32>
    %70 = vector.multi_reduction <minsi>, %69, %cst_25 [0] : vector<128x128xi32> to vector<128xi32>
    %71 = vector.shape_cast %70 : vector<128xi32> to vector<1x128xi32>
    %72 = vector.broadcast %71 : vector<1x128xi32> to vector<128x128xi32>
    %73 = arith.cmpi eq, %22, %72 : vector<128x128xi32>
    %cst_26 = arith.constant 0.000000e+00 : f32
    %74 = vector.broadcast %cst_26 : f32 to vector<128x128xf32>
    %75 = arith.select %73, %33, %74 : vector<128x128xi1>, vector<128x128xf32>
    %cst_27 = arith.constant dense<0.000000e+00> : vector<128xf32>
    %76 = vector.multi_reduction <add>, %75, %cst_27 [0] : vector<128x128xf32> to vector<128xf32>
    %77 = vector.shape_cast %76 : vector<128xf32> to vector<1x128xf32>
    %c0_i32 = arith.constant 0 : i32
    %78 = arith.cmpi eq, %arg1, %c0_i32 : i32
    %79 = arith.extui %78 : i1 to i32
    %c0_i32_28 = arith.constant 0 : i32
    %80 = arith.cmpi ne, %79, %c0_i32_28 : i32
    scf.if %80 {
      %c0_33 = arith.constant 0 : index
      %c0_34 = arith.constant 0 : index
      %87 = vector.load %arg7[%c0_33, %c0_34] : memref<1x128xf32, #tpu.memory_space<vmem>>, vector<1x128xf32>
      tpu.vector_store %arg7[%c0_33, %c0_34], %49 {strides = array<i32>} : memref<1x128xf32, #tpu.memory_space<vmem>>, vector<1x128xf32>,
      %c0_35 = arith.constant 0 : index
      %c0_36 = arith.constant 0 : index
      %88 = vector.load %arg8[%c0_35, %c0_36] : memref<1x128xf32, #tpu.memory_space<vmem>>, vector<1x128xf32>
      tpu.vector_store %arg8[%c0_35, %c0_36], %61 {strides = array<i32>} : memref<1x128xf32, #tpu.memory_space<vmem>>, vector<1x128xf32>,
      %c0_37 = arith.constant 0 : index
      %c0_38 = arith.constant 0 : index
      %89 = vector.load %arg9[%c0_37, %c0_38] : memref<1x128xf32, #tpu.memory_space<vmem>>, vector<1x128xf32>
      tpu.vector_store %arg9[%c0_37, %c0_38], %65 {strides = array<i32>} : memref<1x128xf32, #tpu.memory_space<vmem>>, vector<1x128xf32>,
      %c0_39 = arith.constant 0 : index
      %c0_40 = arith.constant 0 : index
      %90 = vector.load %arg10[%c0_39, %c0_40] : memref<1x128xf32, #tpu.memory_space<vmem>>, vector<1x128xf32>
      tpu.vector_store %arg10[%c0_39, %c0_40], %77 {strides = array<i32>} : memref<1x128xf32, #tpu.memory_space<vmem>>, vector<1x128xf32>,
    } else {
    }
    %c0_i32_29 = arith.constant 0 : i32
    %81 = arith.cmpi sgt, %arg1, %c0_i32_29 : i32
    %82 = arith.extui %81 : i1 to i32
    %c0_i32_30 = arith.constant 0 : i32
    %83 = arith.cmpi ne, %82, %c0_i32_30 : i32
    scf.if %83 {
      %c0_33 = arith.constant 0 : index
      %c0_34 = arith.constant 0 : index
      %87 = vector.load %arg7[%c0_33, %c0_34] : memref<1x128xf32, #tpu.memory_space<vmem>>, vector<1x128xf32>
      %88 = arith.cmpf ogt, %49, %87 : vector<1x128xf32>
      %c0_35 = arith.constant 0 : index
      %c0_36 = arith.constant 0 : index
      %89 = vector.load %arg8[%c0_35, %c0_36] : memref<1x128xf32, #tpu.memory_space<vmem>>, vector<1x128xf32>
      %90 = arith.select %88, %61, %89 : vector<1x128xi1>, vector<1x128xf32>
      %c0_37 = arith.constant 0 : index
      %c0_38 = arith.constant 0 : index
      %91 = vector.load %arg8[%c0_37, %c0_38] : memref<1x128xf32, #tpu.memory_space<vmem>>, vector<1x128xf32>
      tpu.vector_store %arg8[%c0_37, %c0_38], %90 {strides = array<i32>} : memref<1x128xf32, #tpu.memory_space<vmem>>, vector<1x128xf32>,
      %c0_39 = arith.constant 0 : index
      %c0_40 = arith.constant 0 : index
      %92 = vector.load %arg7[%c0_39, %c0_40] : memref<1x128xf32, #tpu.memory_space<vmem>>, vector<1x128xf32>
      %93 = arith.select %88, %49, %92 : vector<1x128xi1>, vector<1x128xf32>
      %c0_41 = arith.constant 0 : index
      %c0_42 = arith.constant 0 : index
      %94 = vector.load %arg7[%c0_41, %c0_42] : memref<1x128xf32, #tpu.memory_space<vmem>>, vector<1x128xf32>
      tpu.vector_store %arg7[%c0_41, %c0_42], %93 {strides = array<i32>} : memref<1x128xf32, #tpu.memory_space<vmem>>, vector<1x128xf32>,
      %c0_43 = arith.constant 0 : index
      %c0_44 = arith.constant 0 : index
      %95 = vector.load %arg9[%c0_43, %c0_44] : memref<1x128xf32, #tpu.memory_space<vmem>>, vector<1x128xf32>
      %96 = arith.cmpf ogt, %65, %95 : vector<1x128xf32>
      %c0_45 = arith.constant 0 : index
      %c0_46 = arith.constant 0 : index
      %97 = vector.load %arg10[%c0_45, %c0_46] : memref<1x128xf32, #tpu.memory_space<vmem>>, vector<1x128xf32>
      %98 = arith.select %96, %77, %97 : vector<1x128xi1>, vector<1x128xf32>
      %c0_47 = arith.constant 0 : index
      %c0_48 = arith.constant 0 : index
      %99 = vector.load %arg10[%c0_47, %c0_48] : memref<1x128xf32, #tpu.memory_space<vmem>>, vector<1x128xf32>
      tpu.vector_store %arg10[%c0_47, %c0_48], %98 {strides = array<i32>} : memref<1x128xf32, #tpu.memory_space<vmem>>, vector<1x128xf32>,
      %c0_49 = arith.constant 0 : index
      %c0_50 = arith.constant 0 : index
      %100 = vector.load %arg9[%c0_49, %c0_50] : memref<1x128xf32, #tpu.memory_space<vmem>>, vector<1x128xf32>
      %101 = arith.select %96, %65, %100 : vector<1x128xi1>, vector<1x128xf32>
      %c0_51 = arith.constant 0 : index
      %c0_52 = arith.constant 0 : index
      %102 = vector.load %arg9[%c0_51, %c0_52] : memref<1x128xf32, #tpu.memory_space<vmem>>, vector<1x128xf32>
      tpu.vector_store %arg9[%c0_51, %c0_52], %101 {strides = array<i32>} : memref<1x128xf32, #tpu.memory_space<vmem>>, vector<1x128xf32>,
    } else {
    }
    %c0_i32_31 = arith.constant 0 : i32
    %84 = arith.cmpi eq, %arg1, %c0_i32_31 : i32
    %85 = arith.extui %84 : i1 to i32
    %c0_i32_32 = arith.constant 0 : i32
    %86 = arith.cmpi ne, %85, %c0_i32_32 : i32
    scf.if %86 {
      %c0_33 = arith.constant 0 : index
      %c0_34 = arith.constant 0 : index
      %87 = vector.load %arg7[%c0_33, %c0_34] : memref<1x128xf32, #tpu.memory_space<vmem>>, vector<1x128xf32>
      %c0_35 = arith.constant 0 : index
      %c0_36 = arith.constant 0 : index
      %88 = vector.load %arg9[%c0_35, %c0_36] : memref<1x128xf32, #tpu.memory_space<vmem>>, vector<1x128xf32>
      %c0_37 = arith.constant 0 : index
      %c0_38 = arith.constant 0 : index
      %89 = vector.load %arg8[%c0_37, %c0_38] : memref<1x128xf32, #tpu.memory_space<vmem>>, vector<1x128xf32>
      %c0_39 = arith.constant 0 : index
      %c0_40 = arith.constant 0 : index
      %90 = vector.load %arg10[%c0_39, %c0_40] : memref<1x128xf32, #tpu.memory_space<vmem>>, vector<1x128xf32>
      %cst_41 = arith.constant -1.000000e+00 : f32
      %91 = vector.broadcast %cst_41 : f32 to vector<1x128xf32>
      %92 = arith.cmpf ogt, %87, %91 : vector<1x128xf32>
      %cst_42 = arith.constant 1.000000e+00 : f32
      %93 = vector.broadcast %cst_42 : f32 to vector<1x128xf32>
      %94 = arith.cmpf olt, %87, %93 : vector<1x128xf32>
      %95 = arith.andi %92, %94 : vector<1x128xi1>
      %cst_43 = arith.constant -1.000000e+00 : f32
      %96 = vector.broadcast %cst_43 : f32 to vector<1x128xf32>
      %97 = arith.cmpf ogt, %88, %96 : vector<1x128xf32>
      %98 = arith.andi %95, %97 : vector<1x128xi1>
      %cst_44 = arith.constant 1.000000e+00 : f32
      %99 = vector.broadcast %cst_44 : f32 to vector<1x128xf32>
      %100 = arith.cmpf olt, %88, %99 : vector<1x128xf32>
      %101 = arith.andi %98, %100 : vector<1x128xi1>
      %102 = arith.cmpf ogt, %90, %89 : vector<1x128xf32>
      %cst_45 = arith.constant 8.000000e-01 : f32
      %103 = vector.broadcast %cst_45 : f32 to vector<1x128xf32>
      %104 = arith.cmpf ogt, %90, %103 : vector<1x128xf32>
      %105 = arith.ori %102, %104 : vector<1x128xi1>
      %106 = arith.andi %105, %101 : vector<1x128xi1>
      %107 = arith.cmpf olt, %90, %89 : vector<1x128xf32>
      %cst_46 = arith.constant 8.000000e-01 : f32
      %108 = vector.broadcast %cst_46 : f32 to vector<1x128xf32>
      %109 = arith.cmpf olt, %90, %108 : vector<1x128xf32>
      %110 = arith.andi %107, %109 : vector<1x128xi1>
      %111 = arith.andi %110, %101 : vector<1x128xi1>
      %cst_47 = arith.constant 1.000000e-01 : f32
      %112 = vector.broadcast %cst_47 : f32 to vector<1x128xf32>
      %113 = arith.divf %89, %112 : vector<1x128xf32>
      %cst_48 = arith.constant 1.000000e-01 : f32
      %114 = vector.broadcast %cst_48 : f32 to vector<1x128xf32>
      %115 = arith.divf %90, %114 : vector<1x128xf32>
      %116 = arith.maximumf %113, %115 : vector<1x128xf32>
      %117 = arith.subf %113, %116 : vector<1x128xf32>
      %118 = math.exp %117 : vector<1x128xf32>
      %119 = arith.subf %115, %116 : vector<1x128xf32>
      %120 = math.exp %119 : vector<1x128xf32>
      %121 = arith.addf %118, %120 : vector<1x128xf32>
      %122 = math.log %121 : vector<1x128xf32>
      %123 = arith.addf %116, %122 : vector<1x128xf32>
      %124 = arith.subf %123, %113 : vector<1x128xf32>
      %cst_49 = arith.constant 1.000000e+00 : f32
      %125 = vector.broadcast %cst_49 : f32 to vector<1x128xf32>
      %126 = arith.mulf %125, %90 : vector<1x128xf32>
      %cst_50 = arith.constant 0.000000e+00 : f32
      %127 = vector.broadcast %cst_50 : f32 to vector<1x128xf32>
      %128 = arith.select %106, %126, %127 : vector<1x128xi1>, vector<1x128xf32>
      %cst_51 = arith.constant 0.000000e+00 : f32
      %129 = vector.broadcast %cst_51 : f32 to vector<1x128xf32>
      %130 = arith.select %111, %124, %129 : vector<1x128xi1>, vector<1x128xf32>
      %131 = arith.addf %128, %130 : vector<1x128xf32>
      %132 = arith.extui %106 : vector<1x128xi1> to vector<1x128xi32>
      %133 = arith.sitofp %132 : vector<1x128xi32> to vector<1x128xf32>
      %134 = arith.extui %111 : vector<1x128xi1> to vector<1x128xi32>
      %135 = arith.sitofp %134 : vector<1x128xi32> to vector<1x128xf32>
      %136 = arith.addf %133, %135 : vector<1x128xf32>
      %c0_52 = arith.constant 0 : index
      %c0_53 = arith.constant 0 : index
      %137 = vector.load %arg6[%c0_52, %c0_53] : memref<4x128xf32, #tpu.memory_space<vmem>>, vector<1x128xf32>
      tpu.vector_store %arg6[%c0_52, %c0_53], %89 {strides = array<i32>} : memref<4x128xf32, #tpu.memory_space<vmem>>, vector<1x128xf32>,
      %c1 = arith.constant 1 : index
      %c0_54 = arith.constant 0 : index
      %138 = vector.load %arg6[%c1, %c0_54] : memref<4x128xf32, #tpu.memory_space<vmem>>, vector<1x128xf32>
      tpu.vector_store %arg6[%c1, %c0_54], %90 {strides = array<i32>} : memref<4x128xf32, #tpu.memory_space<vmem>>, vector<1x128xf32>,
      %c2 = arith.constant 2 : index
      %c0_55 = arith.constant 0 : index
      %139 = vector.load %arg6[%c2, %c0_55] : memref<4x128xf32, #tpu.memory_space<vmem>>, vector<1x128xf32>
      tpu.vector_store %arg6[%c2, %c0_55], %131 {strides = array<i32>} : memref<4x128xf32, #tpu.memory_space<vmem>>, vector<1x128xf32>,
      %c3 = arith.constant 3 : index
      %c0_56 = arith.constant 0 : index
      %140 = vector.load %arg6[%c3, %c0_56] : memref<4x128xf32, #tpu.memory_space<vmem>>, vector<1x128xf32>
      tpu.vector_store %arg6[%c3, %c0_56], %136 {strides = array<i32>} : memref<4x128xf32, #tpu.memory_space<vmem>>, vector<1x128xf32>,
    } else {
    }
    return
  }
  func.func @transform_0(%arg0: i32, %arg1: i32) -> (i32, i32) {
    %c0_i32 = arith.constant 0 : i32
    %c0_i32_0 = arith.constant 0 : i32
    return %arg0, %c0_i32 : i32, i32
  }
  func.func @transform_1(%arg0: i32, %arg1: i32) -> (i32, i32) {
    %c0_i32 = arith.constant 0 : i32
    %c0_i32_0 = arith.constant 0 : i32
    return %arg1, %c0_i32 : i32, i32
  }
  func.func @transform_2(%arg0: i32, %arg1: i32) -> (i32, i32) {
    %c0_i32 = arith.constant 0 : i32
    %c0_i32_0 = arith.constant 0 : i32
    return %c0_i32, %arg0 : i32, i32
  }
  func.func @transform_3(%arg0: i32, %arg1: i32) -> (i32, i32) {
    %c0_i32 = arith.constant 0 : i32
    %c0_i32_0 = arith.constant 0 : i32
    return %arg1, %c0_i32 : i32, i32
  }
  func.func @transform_4(%arg0: i32, %arg1: i32) -> (i32, i32) {
    %c0_i32 = arith.constant 0 : i32
    %c0_i32_0 = arith.constant 0 : i32
    return %c0_i32, %arg0 : i32, i32
  }
}

</mosaic_0001>

<bundles_post_ra>
// kernel: tpu_custom_call.1
= control target key start
LH: loop header
LB: loop body
LE: loop exit
PB: predicated region body
PF: predicated region fallthrough
CT: control target
= control target key end

     0   :  { %vm66_vm0 = vcmask 261120   ;;  %s2885_s0 = inlined_call_operand.vmem [shape: f32[128,32], index: 0, kind: input, shape index: {}]   ;;  %s2886_s1 = inlined_call_operand.vmem [shape: f32[128,32], index: 1, kind: input, shape index: {}]   ;;  %s2887_s2 = inlined_call_operand.vmem [shape: s32[1,128], index: 2, kind: input, shape index: {}]   ;;  %s2888_s3 = inlined_call_operand.vmem [shape: s32[128,1], index: 3, kind: input, shape index: {}]   ;;  %s2889_s4 = inlined_call_operand.hbm [shape: f32[4,128], index: 4, kind: output, shape index: {}]  }
   0x1   :  { %v1851_v0 = vld [vmem:[%s2885_s0 + $0x10] sm:$0xff]  ;;  %v1856_v1 = vld [vmem:[%s2885_s0] sm:$0xff]  ;;  %v1861_v2 = vld [vmem:[%s2885_s0 + $0x18] sm:$0xff] }
   0x2   :  { %v52_v3 = vmul.f32 %v1851_v0, %v1851_v0  ;;  %v50_v4 = vmul.f32 %v1856_v1, %v1856_v1  ;;  %v53_v5 = vmul.f32 %v1861_v2, %v1861_v2  ;;  %v1872_v6 = vld [vmem:[%s2885_s0 + $0x8] sm:$0xff]  ;;  %v1884_v9 = vld [vmem:[%s2885_s0 + $0x20] sm:$0xff]  ;;  %v1897_v16 = vld [vmem:[%s2885_s0 + $0x38] sm:$0xff] }
   0x3   :  { %v51_v7 = vmul.f32 %v1872_v6, %v1872_v6  ;;  %v1879_v8 = vld [vmem:[%s2885_s0 + $0x28] sm:$0xff]  ;;  %v54_v15 = vmul.f32 %v1884_v9, %v1884_v9  ;;  %v1902_v17 = vld [vmem:[%s2885_s0 + $0x30] sm:$0xff] }
   0x4   :  { %v73_v10 = vsel %vm66_vm0, %v52_v3, 0.0  ;;  %v67_v11 = vsel %vm66_vm0, %v50_v4, 0.0  ;;  %v76_v12 = vsel %vm66_vm0, %v53_v5, 0.0  ;;  %v55_v14 = vmul.f32 %v1879_v8, %v1879_v8 }
   0x5   :  { %74 = vadd.xlane.f32.xlu1 %v73_v10  ;;  %68 = vadd.xlane.f32.xlu0 %v67_v11  ;;  %v70_v13 = vsel %vm66_vm0, %v51_v7, 0.0 }
   0x6   :  { %9 = vsyncpa [#allocation7], 0  ;;  %v82_v18 = vsel %vm66_vm0, %v55_v14, 0.0  ;;  %v79_v19 = vsel %vm66_vm0, %v54_v15, 0.0  ;;  %v57_v20 = vmul.f32 %v1897_v16, %v1897_v16  ;;  %v56_v21 = vmul.f32 %v1902_v17, %v1902_v17  ;;  %v1913_v22 = vld [vmem:[%s2885_s0 + $0x48] sm:$0xff]  ;;  %v1918_v23 = vld [vmem:[%s2885_s0 + $0x40] sm:$0xff] }
   0x7   :  { %v59_v26 = vmul.f32 %v1913_v22, %v1913_v22  ;;  %v58_v27 = vmul.f32 %v1918_v23, %v1918_v23  ;;  %v1929_v28 = vld [vmem:[%s2885_s0 + $0x58] sm:$0xff]  ;;  %v1934_v29 = vld [vmem:[%s2885_s0 + $0x50] sm:$0xff]  ;;  %v1945_v34 = vld [vmem:[%s2885_s0 + $0x68] sm:$0xff] }
   0x8   :  { %v88_v24 = vsel %vm66_vm0, %v57_v20, 0.0  ;;  %v85_v25 = vsel %vm66_vm0, %v56_v21, 0.0  ;;  %v61_v32 = vmul.f32 %v1929_v28, %v1929_v28  ;;  %v60_v33 = vmul.f32 %v1934_v29, %v1934_v29  ;;  %v1950_v35 = vld [vmem:[%s2885_s0 + $0x60] sm:$0xff]  ;;  %v1961_v40 = vld [vmem:[%s2885_s0 + $0x78] sm:$0xff]  ;;  %v1966_v41 = vld [vmem:[%s2885_s0 + $0x70] sm:$0xff] }
   0x9   :  { %77 = vadd.xlane.f32.xlu1 %v76_v12  ;;  %71 = vadd.xlane.f32.xlu0 %v70_v13  ;;  %v94_v30 = vsel %vm66_vm0, %v59_v26, 0.0  ;;  %v91_v31 = vsel %vm66_vm0, %v58_v27, 0.0  ;;  %v63_v38 = vmul.f32 %v1945_v34, %v1945_v34  ;;  %v62_v39 = vmul.f32 %v1950_v35, %v1950_v35  ;;  %v1977_v46 = vld [vmem:[%s2886_s1] sm:$0xff]  ;;  %v35_v47 = vld [vmem:[%s2886_s1 + $0x8] sm:$0xff]  ;;  %v2007_v60 = vld [vmem:[%s2886_s1 + $0x50] sm:$0xff] }
   0xa   :  { %v100_v36 = vsel %vm66_vm0, %v61_v32, 0.0  ;;  %v97_v37 = vsel %vm66_vm0, %v60_v33, 0.0  ;;  %v65_v44 = vmul.f32 %v1961_v40, %v1961_v40  ;;  %v64_v45 = vmul.f32 %v1966_v41, %v1966_v41  ;;  %v1991_v54 = vld [vmem:[%s2886_s1 + $0x40] sm:$0xff]  ;;  %v1998_v56 = vld [vmem:[%s2886_s1 + $0x48] sm:$0xff]  ;;  %v2012_v61 = vld [vmem:[%s2886_s1 + $0x10] sm:$0xff] }
   0xb   :  { %v106_v42 = vsel %vm66_vm0, %v63_v38, 0.0  ;;  %v103_v43 = vsel %vm66_vm0, %v62_v39, 0.0  ;;  %v275_v50 = vmul.f32 %v1977_v46, %v1977_v46  ;;  %v276_v51 = vmul.f32 %v35_v47, %v35_v47  ;;  %v2023_v5 = vld [vmem:[%s2886_s1 + $0x58] sm:$0xff]  ;;  %v2039_v14 = vld [vmem:[%s2886_s1 + $0x60] sm:$0xff]  ;;  %v2071_v32 = vld [vmem:[%s2886_s1 + $0x70] sm:$0xff] }
   0xc   :  { %v112_v48 = vsel %vm66_vm0, %v65_v44, 0.0  ;;  %v109_v49 = vsel %vm66_vm0, %v64_v45, 0.0  ;;  %v283_v55 = vmul.f32 %v1991_v54, %v1991_v54  ;;  %v284_v57 = vmul.f32 %v1998_v56, %v1998_v56  ;;  %v2028_v7 = vld [vmem:[%s2886_s1 + $0x18] sm:$0xff]  ;;  %v2044_v15 = vld [vmem:[%s2886_s1 + $0x20] sm:$0xff]  ;;  %v2076_v33 = vld [vmem:[%s2886_s1 + $0x30] sm:$0xff] }
   0xd   :  { %83 = vadd.xlane.f32.xlu1 %v82_v18  ;;  %80 = vadd.xlane.f32.xlu0 %v79_v19  ;;  %v291_v52 = vsel %vm66_vm0, %v275_v50, 0.0  ;;  %v294_v53 = vsel %vm66_vm0, %v276_v51, 0.0  ;;  %v285_v62 = vmul.f32 %v2007_v60, %v2007_v60  ;;  %v277_v63 = vmul.f32 %v2012_v61, %v2012_v61 }
   0xe   :  { %v315_v58 = vsel %vm66_vm0, %v283_v55, 0.0  ;;  %v318_v59 = vsel %vm66_vm0, %v284_v57, 0.0  ;;  %v286_v10 = vmul.f32 %v2023_v5, %v2023_v5  ;;  %v278_v11 = vmul.f32 %v2028_v7, %v2028_v7 }
   0xf   :  { %v321_v3 = vsel %vm66_vm0, %v285_v62, 0.0  ;;  %v297_v4 = vsel %vm66_vm0, %v277_v63, 0.0  ;;  %v287_v18 = vmul.f32 %v2039_v14, %v2039_v14  ;;  %v279_v19 = vmul.f32 %v2044_v15, %v2044_v15 }
  0x10   :  { %v324_v12 = vsel %vm66_vm0, %v286_v10, 0.0  ;;  %v300_v13 = vsel %vm66_vm0, %v278_v11, 0.0  ;;  %v1819_v50 = vmov 0  }
  0x11   :  { %89 = vadd.xlane.f32.xlu1 %v88_v24  ;;  %86 = vadd.xlane.f32.xlu0 %v85_v25  ;;  %v327_v20 = vsel %vm66_vm0, %v287_v18, 0.0  ;;  %v303_v21 = vsel %vm66_vm0, %v279_v19, 0.0  ;;  %v2055_v24 = vld [vmem:[%s2886_s1 + $0x68] sm:$0xff] }
  0x12   :  { %v2060_v25 = vld [vmem:[%s2886_s1 + $0x28] sm:$0xff]  ;;  %v288_v26 = vmul.f32 %v2055_v24, %v2055_v24  ;;  %1659 = vset.pattern.permute.xlu0 %v1819_v50 }
  0x13   :  { %v280_v27 = vmul.f32 %v2060_v25, %v2060_v25 }
  0x15   :  { %95 = vadd.xlane.f32.xlu1 %v94_v30  ;;  %92 = vadd.xlane.f32.xlu0 %v91_v31  ;;  %v330_v30 = vsel %vm66_vm0, %v288_v26, 0.0  ;;  %v306_v31 = vsel %vm66_vm0, %v280_v27, 0.0 }
  0x19   :  { %101 = vadd.xlane.f32.xlu1 %v100_v36  ;;  %98 = vadd.xlane.f32.xlu0 %v97_v37  ;;  %v289_v36 = vmul.f32 %v2071_v32, %v2071_v32  ;;  %v281_v37 = vmul.f32 %v2076_v33, %v2076_v33 }
  0x1b   :  { %v333_v38 = vsel %vm66_vm0, %v289_v36, 0.0  ;;  %v309_v39 = vsel %vm66_vm0, %v281_v37, 0.0 }
  0x1d   :  { %107 = vadd.xlane.f32.xlu1 %v106_v42  ;;  %104 = vadd.xlane.f32.xlu0 %v103_v43  ;;  %v2087_v42 = vld [vmem:[%s2886_s1 + $0x78] sm:$0xff] }
  0x1e   :  { %v2092_v43 = vld [vmem:[%s2886_s1 + $0x38] sm:$0xff]  ;;  %v290_v44 = vmul.f32 %v2087_v42, %v2087_v42 }
  0x1f   :  { %v282_v45 = vmul.f32 %v2092_v43, %v2092_v43 }
  0x20   :  { %v336_v47 = vsel %vm66_vm0, %v290_v44, 0.0 }
  0x21   :  { %113 = vadd.xlane.f32.xlu1 %v112_v48  ;;  %110 = vadd.xlane.f32.xlu0 %v109_v49  ;;  %v312_v48 = vsel %vm66_vm0, %v282_v45, 0.0  ;;  %v860_v49 = vld [vmem:[%s2888_s3] sm:$0xff] }
  0x25   :  { %292 = vadd.xlane.f32.xlu0 %v291_v52  ;;  %295 = vadd.xlane.f32.xlu1 %v294_v53 }
  0x29   :  { %316 = vadd.xlane.f32.xlu0 %v315_v58  ;;  %319 = vadd.xlane.f32.xlu1 %v318_v59 }
  0x2d   :  { %322 = vadd.xlane.f32.xlu1 %v321_v3  ;;  %298 = vadd.xlane.f32.xlu0 %v297_v4 }
  0x31   :  { %325 = vadd.xlane.f32.xlu1 %v324_v12  ;;  %301 = vadd.xlane.f32.xlu0 %v300_v13 }
  0x35   :  { %328 = vadd.xlane.f32.xlu1 %v327_v20  ;;  %304 = vadd.xlane.f32.xlu0 %v303_v21 }
  0x39   :  { %331 = vadd.xlane.f32.xlu1 %v330_v30  ;;  %307 = vadd.xlane.f32.xlu0 %v306_v31 }
  0x3d   :  { %334 = vadd.xlane.f32.xlu1 %v333_v38  ;;  %310 = vadd.xlane.f32.xlu0 %v309_v39 }
  0x41   :  { %337 = vadd.xlane.f32.xlu1 %v336_v47  ;;  %313 = vadd.xlane.f32.xlu0 %v312_v48 }
  0x57   :  { %878 = vperm.xlu0 %1659, %v860_v49  }
  0x92   :  { %v75_v51 = vpop.xlane.xlu1 %74  ;;  %v69_v52 = vpop.xlane.xlu0 %68 }
  0x93   :  { %1660 = vrsqrt.f32 %v75_v51  ;;  %vm131_vm1 = vcmp.eq.f32.partialorder %v75_v51, inf  ;;  %vm133_vm2 = vcmp.eq.f32.partialorder %v75_v51, 0.0  ;;  %v134_v3 = vand.u32 2147483648, %v75_v51 }
  0x94   :  { %1662 = vrsqrt.f32 %v69_v52  ;;  %vm117_vm3 = vcmp.eq.f32.partialorder %v69_v52, inf  ;;  %vm119_vm4 = vcmp.eq.f32.partialorder %v69_v52, 0.0  ;;  %v120_v12 = vand.u32 2147483648, %v69_v52 }
  0x96   :  { %v78_v53 = vpop.xlane.xlu1 %77  ;;  %v72_v55 = vpop.xlane.xlu0 %71 }
  0x97   :  { %1664 = vrsqrt.f32 %v78_v53  ;;  %vm138_vm5 = vcmp.eq.f32.partialorder %v78_v53, inf  ;;  %vm140_vm6 = vcmp.eq.f32.partialorder %v78_v53, 0.0  ;;  %v141_v18 = vand.u32 2147483648, %v78_v53 }
  0x98   :  { %1666 = vrsqrt.f32 %v72_v55  ;;  %vm124_vm7 = vcmp.eq.f32.partialorder %v72_v55, inf  ;;  %vm126_vm8 = vcmp.eq.f32.partialorder %v72_v55, 0.0  ;;  %v127_v36 = vand.u32 2147483648, %v72_v55 }
  0x9a   :  { %v2103_v57 = vpop.xlane.xlu1 %83  ;;  %v2105_v58 = vpop.xlane.xlu0 %80 }
  0x9b   :  { %1668 = vrsqrt.f32 %v2103_v57  ;;  %vm152_vm9 = vcmp.eq.f32.partialorder %v2103_v57, inf  ;;  %vm154_vm10 = vcmp.eq.f32.partialorder %v2103_v57, 0.0  ;;  %v155_v47 = vand.u32 2147483648, %v2103_v57 }
  0x9c   :  { %1670 = vrsqrt.f32 %v2105_v58  ;;  %vm145_vm11 = vcmp.eq.f32.partialorder %v2105_v58, inf  ;;  %vm147_vm12 = vcmp.eq.f32.partialorder %v2105_v58, 0.0 }
  0x9d   :  { %v1661_v59 = vpop.eup %1660 }
  0x9e   :  { %v1663_v62 = vpop.eup %1662  ;;  %v130_v63 = vmul.f32 %v1661_v59, %v75_v51  ;;  %v2109_v4 = vpop.xlane.xlu1 %89 }
  0x9f   :  { %v2111_v10 = vpop.xlane.xlu0 %86  ;;  %v116_v11 = vmul.f32 %v1663_v62, %v69_v52  ;;  %1672 = vrsqrt.f32 %v2109_v4  ;;  %vm166_vm13 = vcmp.eq.f32.partialorder %v2109_v4, inf  ;;  %vm168_vm15 = vcmp.eq.f32.partialorder %v2109_v4, 0.0 }
  0xa0   :  { %v132_v13 = vsel %vm131_vm1, %v75_v51, %v130_v63  ;;  %1674 = vrsqrt.f32 %v2111_v10  ;;  %v148_v51 = vand.u32 2147483648, %v2105_v58  ;;  %vm159_vm14 = vcmp.eq.f32.partialorder %v2111_v10, inf }
  0xa1   :  { %v1665_v19 = vpop.eup %1664  ;;  %v135_v20 = vsel %vm133_vm2, %v134_v3, %v132_v13  ;;  %v118_v21 = vsel %vm117_vm3, %v69_v52, %v116_v11  ;;  %vm161_vm1 = vcmp.eq.f32.partialorder %v2111_v10, 0.0 }
  0xa2   :  { %v1667_v26 = vpop.eup %1666  ;;  %v229_v27 = vmax.f32 %v135_v20, 1e-12  ;;  %v121_v30 = vsel %vm119_vm4, %v120_v12, %v118_v21  ;;  %v137_v31 = vmul.f32 %v1665_v19, %v78_v53  ;;  %v2117_v37 = vpop.xlane.xlu1 %95 }
  0xa3   :  { %v227_v38 = vmax.f32 %v121_v30, 1e-12  ;;  %v123_v39 = vmul.f32 %v1667_v26, %v72_v55  ;;  %1676 = vrsqrt.f32 %v2117_v37  ;;  %v2121_v44 = vpop.xlane.xlu0 %92  ;;  %vm180_vm2 = vcmp.eq.f32.partialorder %v2117_v37, inf }
  0xa4   :  { %v139_v45 = vsel %vm138_vm5, %v78_v53, %v137_v31  ;;  %1678 = vrcp.f32 %v229_v27  ;;  %v169_v31 = vand.u32 2147483648, %v2109_v4  ;;  %vm182_vm3 = vcmp.eq.f32.partialorder %v2117_v37, 0.0 }
  0xa5   :  { %v1669_v48 = vpop.eup %1668  ;;  %v142_v49 = vsel %vm140_vm6, %v141_v18, %v139_v45  ;;  %v125_v50 = vsel %vm124_vm7, %v72_v55, %v123_v39  ;;  %1680 = vrsqrt.f32 %v2121_v44  ;;  %vm173_vm4 = vcmp.eq.f32.partialorder %v2121_v44, inf }
  0xa6   :  { %v1671_v52 = vpop.eup %1670  ;;  %v230_v59 = vmax.f32 %v142_v49, 1e-12  ;;  %v128_v62 = vsel %vm126_vm8, %v127_v36, %v125_v50  ;;  %v151_v63 = vmul.f32 %v1669_v48, %v2103_v57  ;;  %1682 = vrcp.f32 %v227_v38  ;;  %v2135_v53 = vpop.xlane.xlu1 %101 }
  0xa7   :  { %v228_v3 = vmax.f32 %v128_v62, 1e-12  ;;  %v144_v11 = vmul.f32 %v1671_v52, %v2105_v58  ;;  %v2141_v55 = vpop.xlane.xlu0 %98  ;;  %v162_v38 = vand.u32 2147483648, %v2111_v10  ;;  %vm175_vm5 = vcmp.eq.f32.partialorder %v2121_v44, 0.0 }
  0xa8   :  { %1684 = vrcp.f32 %v230_v59  ;;  %v153_v12 = vsel %vm152_vm9, %v2103_v57, %v151_v63  ;;  %vm194_vm6 = vcmp.eq.f32.partialorder %v2135_v53, inf  ;;  %vm196_vm7 = vcmp.eq.f32.partialorder %v2135_v53, 0.0 }
  0xa9   :  { %v1673_v13 = vpop.eup %1672  ;;  %1686 = vrcp.f32 %v228_v3  ;;  %v156_v18 = vsel %vm154_vm10, %v155_v47, %v153_v12  ;;  %v146_v19 = vsel %vm145_vm11, %v2105_v58, %v144_v11  ;;  %v197_v3 = vand.u32 2147483648, %v2135_v53  ;;  %vm2202_vm10 = vmpackc.low %vm66_vm0, %vm66_vm0 }
  0xaa   :  { %v1675_v20 = vpop.eup %1674  ;;  %v232_v21 = vmax.f32 %v156_v18, 1e-12  ;;  %v149_v26 = vsel %vm147_vm12, %v148_v51, %v146_v19  ;;  %v165_v27 = vmul.f32 %v1673_v13, %v2109_v4  ;;  %1688 = vrsqrt.f32 %v2135_v53  ;;  %v2154_v57 = vpop.xlane.xlu1 %107 }
  0xab   :  { %v231_v30 = vmax.f32 %v149_v26, 1e-12  ;;  %v158_v36 = vmul.f32 %v1675_v20, %v2111_v10  ;;  %1690 = vrsqrt.f32 %v2141_v55  ;;  %v2165_v47 = vpop.xlane.xlu0 %104  ;;  %vm187_vm8 = vcmp.eq.f32.partialorder %v2141_v55, inf }
  0xac   :  { %1692 = vrcp.f32 %v232_v21  ;;  %v167_v58 = vsel %vm166_vm13, %v2109_v4, %v165_v27  ;;  %v183_v4 = vand.u32 2147483648, %v2117_v37  ;;  %vm189_vm9 = vcmp.eq.f32.partialorder %v2141_v55, 0.0 }
  0xad   :  { %v1677_v39 = vpop.eup %1676  ;;  %1694 = vrcp.f32 %v231_v30  ;;  %v160_v45 = vsel %vm159_vm14, %v2111_v10, %v158_v36  ;;  %v170_v50 = vsel %vm168_vm15, %v169_v31, %v167_v58  ;;  %v176_v10 = vand.u32 2147483648, %v2121_v44 }
  0xae   :  { %v179_v48 = vmul.f32 %v1677_v39, %v2117_v37  ;;  %1696 = vrsqrt.f32 %v2154_v57  ;;  %v1679_v49 = vpop.eup %1678  ;;  %v163_v52 = vsel %vm161_vm1, %v162_v38, %v160_v45  ;;  %v2175_v59 = vpop.xlane.xlu1 %113  ;;  %v234_v13 = vmax.f32 %v170_v50, 1e-12 }
  0xaf   :  { %v1681_v51 = vpop.eup %1680  ;;  %v2181_v11 = vpop.xlane.xlu0 %110  ;;  %1698 = vrsqrt.f32 %v2165_v47  ;;  %v233_v20 = vmax.f32 %v163_v52, 1e-12  ;;  %v190_v21 = vand.u32 2147483648, %v2141_v55  ;;  %vm208_vm11 = vcmp.eq.f32.partialorder %v2154_v57, inf }
  0xb0   :  { %v1683_v62 = vpop.eup %1682  ;;  %v172_v63 = vmul.f32 %v1681_v51, %v2121_v44  ;;  %v181_v18 = vsel %vm180_vm2, %v2117_v37, %v179_v48  ;;  %1700 = vrsqrt.f32 %v2175_v59  ;;  %v248_v48 = vmul.f32 %v1679_v49, %v1851_v0 }
  0xb1   :  { %v244_v30 = vmul.f32 %v1683_v62, %v1856_v1  ;;  %v184_v38 = vsel %vm182_vm3, %v183_v4, %v181_v18  ;;  %1702 = vrsqrt.f32 %v2181_v11  ;;  %v211_v52 = vand.u32 2147483648, %v2154_v57 }
  0xb2   :  { %v1685_v12 = vpop.eup %1684  ;;  %v174_v27 = vsel %vm173_vm4, %v2121_v44, %v172_v63  ;;  %1704 = vrcp.f32 %v234_v13  ;;  %v236_v63 = vmax.f32 %v184_v38, 1e-12  ;;  %vm210_vm12 = vcmp.eq.f32.partialorder %v2154_v57, 0.0 }
  0xb3   :  { %v1687_v19 = vpop.eup %1686  ;;  %v250_v36 = vmul.f32 %v1685_v12, %v1861_v2  ;;  %v2208_v1 = vpop.xlane.xlu0 %292  ;;  %1706 = vrcp.f32 %v233_v20  ;;  %v177_v4 = vsel %vm175_vm5, %v176_v10, %v174_v27  ;;  %vm201_vm13 = vcmp.eq.f32.partialorder %v2165_v47, inf }
  0xb4   :  { %v1689_v26 = vpop.eup %1688  ;;  %v246_v31 = vmul.f32 %v1687_v19, %v1872_v6  ;;  %1708 = vrsqrt.f32 %v2208_v1  ;;  %v235_v10 = vmax.f32 %v177_v4, 1e-12  ;;  %vm203_vm14 = vcmp.eq.f32.partialorder %v2165_v47, 0.0 }
  0xb5   :  { %v1691_v58 = vpop.eup %1690  ;;  %v193_v39 = vmul.f32 %v1689_v26, %v2135_v53  ;;  %v1597_v0 = vpack.c.bf16 %v250_v36, %v248_v48  ;;  %vm222_vm15 = vcmp.eq.f32.partialorder %v2175_v59, inf  ;;  %1710 = vrcp.f32 %v236_v63 }
  0xb6   :  { %v1693_v6 = vpop.eup %1692  ;;  %v186_v2 = vmul.f32 %v1691_v58, %v2141_v55  ;;  %v1591_v37 = vpack.c.bf16 %v246_v31, %v244_v30  ;;  %vm224_vm1 = vcmp.eq.f32.partialorder %v2175_v59, 0.0  ;;  %v225_v36 = vand.u32 2147483648, %v2175_v59 }
  0xb7   :  { %v1695_v50 = vpop.eup %1694  ;;  %v195_v51 = vsel %vm194_vm6, %v2135_v53, %v193_v39  ;;  %v204_v53 = vand.u32 2147483648, %v2165_v47  ;;  %v254_v19 = vmul.f32 %v1693_v6, %v1879_v8  ;;  %vm215_vm2 = vcmp.eq.f32.partialorder %v2181_v11, inf }
  0xb8   :  { %v1697_v62 = vpop.eup %1696  ;;  %v188_v12 = vsel %vm187_vm8, %v2141_v55, %v186_v2  ;;  %1593 = vmatprep.subr.msk.bf16.mxu0 %vm2202_vm10, %v1591_v37  ;;  %1639 = vmatprep.subr.msk.bf16.mxu1 %vm2202_vm10, %v1591_v37  ;;  %v198_v44 = vsel %vm196_vm7, %v197_v3, %v195_v51  ;;  %v2243_v3 = vpop.xlane.xlu1 %295  ;;  %v252_v55 = vmul.f32 %v1695_v50, %v1884_v9  ;;  %vm217_vm3 = vcmp.eq.f32.partialorder %v2181_v11, 0.0 }
  0xb9   :  { %1596 = vmatpush3.bf16.xpose.msk.msra.mxu0 %vm2202_vm10, %v1591_v37  ;;  %1647 = vmatpush3.bf16.xpose.msk.msra.mxu1 %vm2202_vm10, %v1591_v37  ;;  %v207_v49 = vmul.f32 %v1697_v62, %v2154_v57  ;;  %v191_v13 = vsel %vm189_vm9, %v190_v21, %v188_v12  ;;  %v1699_v20 = vpop.eup %1698  ;;  %v238_v21 = vmax.f32 %v198_v44, 1e-12  ;;  %1712 = vrsqrt.f32 %v2243_v3 }
  0xba   :  { %1599 = vmatprep.subr.msk.bf16.mxu0 %vm2202_vm10, %v1597_v0  ;;  %1640 = vmatprep.subr.msk.bf16.mxu1 %vm2202_vm10, %v1597_v0  ;;  %v1701_v27 = vpop.eup %1700  ;;  %v237_v30 = vmax.f32 %v191_v13, 1e-12  ;;  %v200_v31 = vmul.f32 %v1699_v20, %v2165_v47  ;;  %1714 = vrcp.f32 %v235_v10  ;;  %v1603_v38 = vpack.c.bf16 %v254_v19, %v252_v55 }
  0xbb   :  { %v209_v18 = vsel %vm208_vm11, %v2154_v57, %v207_v49  ;;  %v221_v9 = vmul.f32 %v1701_v27, %v2175_v59  ;;  %v1703_v8 = vpop.eup %1702  ;;  %v218_v39 = vand.u32 2147483648, %v2181_v11  ;;  %1716 = vrcp.f32 %v238_v21 }
  0xbc   :  { %v212_v26 = vsel %vm210_vm12, %v211_v52, %v209_v18  ;;  %v202_v58 = vsel %vm201_vm13, %v2165_v47, %v200_v31  ;;  %v1705_v6 = vpop.eup %1704  ;;  %v214_v48 = vmul.f32 %v1703_v8, %v2181_v11  ;;  %1718 = vrcp.f32 %v237_v30  ;;  %v2293_v13 = vpop.xlane.xlu1 %319 }
  0xbd   :  { %v240_v57 = vmax.f32 %v212_v26, 1e-12  ;;  %v205_v2 = vsel %vm203_vm14, %v204_v53, %v202_v58  ;;  %v223_v37 = vsel %vm222_vm15, %v2175_v59, %v221_v9  ;;  %v1707_v50 = vpop.eup %1706  ;;  %vm341_vm4 = vcmp.eq.f32.partialorder %v2208_v1, inf }
  0xbe   :  { %v239_v4 = vmax.f32 %v205_v2, 1e-12  ;;  %v226_v51 = vsel %vm224_vm1, %v225_v36, %v223_v37  ;;  %v1709_v47 = vpop.eup %1708  ;;  %v216_v62 = vsel %vm215_vm2, %v2181_v11, %v214_v48  ;;  %v344_v63 = vand.u32 2147483648, %v2208_v1 }
  0xbf   :  { %v242_v52 = vmax.f32 %v226_v51, 1e-12  ;;  %1720 = vrcp.f32 %v240_v57  ;;  %v219_v59 = vsel %vm217_vm3, %v218_v39, %v216_v62  ;;  %v340_v12 = vmul.f32 %v1709_v47, %v2208_v1  ;;  %v1711_v18 = vpop.eup %1710 }
  0xc0   :  { %vm343_vm5 = vcmp.eq.f32.partialorder %v2208_v1, 0.0  ;;  %1722 = vrcp.f32 %v239_v4  ;;  %v241_v44 = vmax.f32 %v219_v59, 1e-12  ;;  %v256_v49 = vmul.f32 %v1707_v50, %v1902_v17  ;;  %v2298_v26 = vpop.xlane.xlu1 %322 }
  0xc1   :  { %1602 = vmatpush3.bf16.xpose.msk.msra.mxu0 %vm2202_vm10, %v1597_v0  ;;  %1648 = vmatpush3.bf16.xpose.msk.msra.mxu1 %vm2202_vm10, %v1597_v0  ;;  %v2289_v0 = vpop.xlane.xlu0 %316  ;;  %v258_v10 = vmul.f32 %v1705_v6, %v1897_v16  ;;  %1724 = vrcp.f32 %v242_v52  ;;  %v342_v53 = vsel %vm341_vm4, %v2208_v1, %v340_v12  ;;  %vm348_vm6 = vcmp.eq.f32.partialorder %v2243_v3, inf }
  0xc2   :  { %1605 = vmatprep.subr.msk.bf16.mxu0 %vm2202_vm10, %v1603_v38  ;;  %1641 = vmatprep.subr.msk.bf16.mxu1 %vm2202_vm10, %v1603_v38  ;;  %v345_v11 = vsel %vm343_vm5, %v344_v63, %v342_v53  ;;  %1726 = vrsqrt.f32 %v2289_v0  ;;  %v262_v31 = vmul.f32 %v1711_v18, %v1913_v22  ;;  %vm350_vm7 = vcmp.eq.f32.partialorder %v2243_v3, 0.0 }
  0xc3   :  { %v1713_v55 = vpop.eup %1712  ;;  %v451_v19 = vmax.f32 %v345_v11, 1e-12  ;;  %1728 = vrsqrt.f32 %v2293_v13  ;;  %v1609_v21 = vpack.c.bf16 %v258_v10, %v256_v49  ;;  %v351_v57 = vand.u32 2147483648, %v2243_v3 }
  0xc4   :  { %v1715_v20 = vpop.eup %1714  ;;  %1730 = vrcp.f32 %v241_v44  ;;  %v347_v1 = vmul.f32 %v1713_v55, %v2243_v3  ;;  %v2316_v36 = vpop.xlane.xlu1 %325  ;;  %vm397_vm8 = vcmp.eq.f32.partialorder %v2289_v0, inf  ;;  %v400_v37 = vand.u32 2147483648, %v2289_v0 }
  0xc5   :  { %v2300_v17 = vpop.xlane.xlu0 %298  ;;  %1732 = vrcp.f32 %v451_v19  ;;  %v1717_v16 = vpop.eup %1716  ;;  %v260_v30 = vmul.f32 %v1715_v20, %v1918_v23  ;;  %vm404_vm9 = vcmp.eq.f32.partialorder %v2293_v13, inf  ;;  %vm406_vm11 = vcmp.eq.f32.partialorder %v2293_v13, 0.0 }
  0xc6   :  { %1734 = vrsqrt.f32 %v2298_v26  ;;  %v1719_v27 = vpop.eup %1718  ;;  %v266_v6 = vmul.f32 %v1717_v16, %v1929_v28  ;;  %v407_v4 = vand.u32 2147483648, %v2293_v13  ;;  %vm411_vm12 = vcmp.eq.f32.partialorder %v2298_v26, inf }
  0xc7   :  { %1736 = vrsqrt.f32 %v2300_v17  ;;  %v264_v39 = vmul.f32 %v1719_v27, %v1934_v29  ;;  %v1615_v2 = vpack.c.bf16 %v262_v31, %v260_v30  ;;  %vm399_vm13 = vcmp.eq.f32.partialorder %v2289_v0, 0.0 }
  0xc8   :  { %1738 = vrsqrt.f32 %v2316_v36  ;;  %v2330_v48 = vpop.xlane.xlu1 %328  ;;  %vm413_vm14 = vcmp.eq.f32.partialorder %v2298_v26, 0.0  ;;  %v414_v63 = vand.u32 2147483648, %v2298_v26  ;;  %vm355_vm15 = vcmp.eq.f32.partialorder %v2300_v17, inf }
  0xc9   :  { %1608 = vmatpush3.bf16.xpose.msk.msra.mxu0 %vm2202_vm10, %v1603_v38  ;;  %1649 = vmatpush3.bf16.xpose.msk.msra.mxu1 %vm2202_vm10, %v1603_v38  ;;  %v2318_v9 = vpop.xlane.xlu0 %301  ;;  %v1721_v8 = vpop.eup %1720  ;;  %v349_v38 = vsel %vm348_vm6, %v2243_v3, %v347_v1  ;;  %v2347_v3 = vpack.c.bf16 %v266_v6, %v264_v39  ;;  %vm357_vm1 = vcmp.eq.f32.partialorder %v2300_v17, 0.0  ;;  %v358_v49 = vand.u32 2147483648, %v2300_v17 }
  0xca   :  { %1611 = vmatprep.subr.msk.bf16.mxu0 %vm2202_vm10, %v1609_v21  ;;  %1642 = vmatprep.subr.msk.bf16.mxu1 %vm2202_vm10, %v1609_v21  ;;  %v1723_v58 = vpop.eup %1722  ;;  %1740 = vrsqrt.f32 %v2318_v9  ;;  %v352_v28 = vsel %vm350_vm7, %v351_v57, %v349_v38  ;;  %v270_v62 = vmul.f32 %v1721_v8, %v1945_v34  ;;  %vm418_vm2 = vcmp.eq.f32.partialorder %v2316_v36, inf }
  0xcb   :  { %v1725_v23 = vpop.eup %1724  ;;  %1742 = vrsqrt.f32 %v2330_v48  ;;  %v452_v12 = vmax.f32 %v352_v28, 1e-12  ;;  %v268_v18 = vmul.f32 %v1723_v58, %v1950_v35  ;;  %v421_v20 = vand.u32 2147483648, %v2316_v36 }
  0xcc   :  { %v1727_v22 = vpop.eup %1726  ;;  %v2360_v10 = vpop.xlane.xlu1 %331  ;;  %vm420_vm3 = vcmp.eq.f32.partialorder %v2316_v36, 0.0  ;;  %vm362_vm4 = vcmp.eq.f32.partialorder %v2318_v9, inf  ;;  %vm364_vm5 = vcmp.eq.f32.partialorder %v2318_v9, 0.0  ;;  %v365_v8 = vand.u32 2147483648, %v2318_v9 }
  0xcd   :  { %v2332_v50 = vpop.xlane.xlu0 %304  ;;  %v1729_v29 = vpop.eup %1728  ;;  %v2392_v30 = vpack.c.bf16 %v270_v62, %v268_v18  ;;  %vm425_vm6 = vcmp.eq.f32.partialorder %v2330_v48, inf  ;;  %vm427_vm7 = vcmp.eq.f32.partialorder %v2330_v48, 0.0 }
  0xce   :  { %v1731_v51 = vpop.eup %1730  ;;  %v403_v47 = vmul.f32 %v1729_v29, %v2293_v13  ;;  %1744 = vrsqrt.f32 %v2332_v50 }
  0xcf   :  { %v1733_v52 = vpop.eup %1732  ;;  %1746 = vrsqrt.f32 %v2360_v10  ;;  %v272_v35 = vmul.f32 %v1731_v51, %v1966_v41  ;;  %v372_v51 = vand.u32 2147483648, %v2332_v50 }
  0xd0   :  { %v1735_v59 = vpop.eup %1734  ;;  %v468_v44 = vmul.f32 %v1733_v52, %v1977_v46  ;;  %v405_v11 = vsel %vm404_vm9, %v2293_v13, %v403_v47  ;;  %v396_v46 = vmul.f32 %v1727_v22, %v2289_v0  ;;  %v2386_v41 = vpop.xlane.xlu1 %334  ;;  %vm371_vm9 = vcmp.eq.f32.partialorder %v2332_v50, 0.0 }
  0xd1   :  { %1614 = vmatpush3.bf16.xpose.msk.msra.mxu0 %vm2202_vm10, %v1609_v21  ;;  %1650 = vmatpush3.bf16.xpose.msk.msra.mxu1 %vm2202_vm10, %v1609_v21  ;;  %v2362_v53 = vpop.xlane.xlu0 %307  ;;  %v1737_v34 = vpop.eup %1736  ;;  %v410_v55 = vmul.f32 %v1735_v59, %v2298_v26  ;;  %v274_v21 = vmul.f32 %v1725_v23, %v1961_v40  ;;  %v408_v27 = vsel %vm406_vm11, %v407_v4, %v405_v11  ;;  %v428_v23 = vand.u32 2147483648, %v2330_v48 }
  0xd2   :  { %1617 = vmatprep.subr.msk.bf16.mxu0 %vm2202_vm10, %v1615_v2  ;;  %1643 = vmatprep.subr.msk.bf16.mxu1 %vm2202_vm10, %v1615_v2  ;;  %v354_v19 = vmul.f32 %v1737_v34, %v2300_v17  ;;  %1748 = vrsqrt.f32 %v2362_v53  ;;  %v1739_v1 = vpop.eup %1738  ;;  %v398_v57 = vsel %vm397_vm8, %v2289_v0, %v396_v46  ;;  %v460_v39 = vmax.f32 %v408_v27, 1e-12 }
  0xd3   :  { %1567 = vmatprep.mubr.msk.f32.mxu0 %vm66_vm0, %v468_v44  ;;  %v412_v16 = vsel %vm411_vm12, %v2298_v26, %v410_v55  ;;  %1750 = vrcp.f32 %v452_v12  ;;  %v2414_v38 = vpack.c.bf16 %v274_v21, %v272_v35  ;;  %v417_v6 = vmul.f32 %v1739_v1, %v2316_v36 }
  0xd4   :  { %v1741_v40 = vpop.eup %1740  ;;  %v415_v31 = vsel %vm413_vm14, %v414_v63, %v412_v16  ;;  %v356_v13 = vsel %vm355_vm15, %v2300_v17, %v354_v19  ;;  %1752 = vrsqrt.f32 %v2386_v41  ;;  %vm369_vm8 = vcmp.eq.f32.partialorder %v2332_v50, inf  ;;  %v2429_v17 = vpop.xlane.xlu1 %337 }
  0xd5   :  { %v2412_v26 = vpop.xlane.xlu0 %310  ;;  %v1743_v58 = vpop.eup %1742  ;;  %v359_v29 = vsel %vm357_vm1, %v358_v49, %v356_v13  ;;  %v361_v28 = vmul.f32 %v1741_v40, %v2318_v9  ;;  %vm432_vm11 = vcmp.eq.f32.partialorder %v2360_v10, inf  ;;  %vm434_vm12 = vcmp.eq.f32.partialorder %v2360_v10, 0.0 }
  0xd6   :  { %v424_v4 = vmul.f32 %v1743_v58, %v2330_v48  ;;  %1754 = vrsqrt.f32 %v2412_v26  ;;  %v401_v52 = vsel %vm399_vm13, %v400_v37, %v398_v57  ;;  %v453_v63 = vmax.f32 %v359_v29, 1e-12 }
  0xd7   :  { %1756 = vrcp.f32 %v460_v39  ;;  %v419_v59 = vsel %vm418_vm2, %v2316_v36, %v417_v6  ;;  %v435_v12 = vand.u32 2147483648, %v2360_v10  ;;  %v363_v44 = vsel %vm362_vm4, %v2318_v9, %v361_v28 }
  0xd8   :  { %v1745_v22 = vpop.eup %1744  ;;  %vm376_vm14 = vcmp.eq.f32.partialorder %v2362_v53, inf  ;;  %v426_v37 = vsel %vm425_vm6, %v2330_v48, %v424_v4  ;;  %vm378_vm13 = vcmp.eq.f32.partialorder %v2362_v53, 0.0  ;;  %v379_v34 = vand.u32 2147483648, %v2362_v53 }
  0xd9   :  { %1620 = vmatpush3.bf16.xpose.msk.msra.mxu0 %vm2202_vm10, %v1615_v2  ;;  %1651 = vmatpush3.bf16.xpose.msk.msra.mxu1 %vm2202_vm10, %v1615_v2  ;;  %v461_v2 = vmax.f32 %v415_v31, 1e-12  ;;  %v368_v47 = vmul.f32 %v1745_v22, %v2332_v50  ;;  %v1747_v62 = vpop.eup %1746  ;;  %v2456_v18 = vpop.xlane.xlu0 %313  ;;  %vm439_vm15 = vcmp.eq.f32.partialorder %v2386_v41, inf  ;;  %v366_v19 = vsel %vm364_vm5, %v365_v8, %v363_v44 }
  0xda   :  { %1623 = vmatprep.subr.msk.bf16.mxu0 %vm2202_vm10, %v2347_v3  ;;  %1644 = vmatprep.subr.msk.bf16.mxu1 %vm2202_vm10, %v2347_v3  ;;  %v431_v49 = vmul.f32 %v1747_v62, %v2360_v10  ;;  %vm441_vm1 = vcmp.eq.f32.partialorder %v2386_v41, 0.0  ;;  %v442_v16 = vand.u32 2147483648, %v2386_v41  ;;  %v459_v40 = vmax.f32 %v401_v52, 1e-12 }
  0xdb   :  { %1758 = vrcp.f32 %v461_v2  ;;  %v370_v55 = vsel %vm369_vm8, %v2332_v50, %v368_v47  ;;  %v454_v31 = vmax.f32 %v366_v19, 1e-12  ;;  %vm383_vm2 = vcmp.eq.f32.partialorder %v2412_v26, inf }
  0xdc   :  { %v1749_v0 = vpop.eup %1748  ;;  %1760 = vrsqrt.f32 %v2429_v17  ;;  %v433_v35 = vsel %vm432_vm11, %v2360_v10, %v431_v49  ;;  %v373_v1 = vsel %vm371_vm9, %v372_v51, %v370_v55  ;;  %v386_v13 = vand.u32 2147483648, %v2412_v26 }
  0xdd   :  { %v2458_v11 = vpop.eup %1750  ;;  %v375_v46 = vmul.f32 %v1749_v0, %v2362_v53  ;;  %1762 = vrcp.f32 %v453_v63  ;;  %v436_v48 = vsel %vm434_vm12, %v435_v12, %v433_v35  ;;  %v455_v39 = vmax.f32 %v373_v1, 1e-12 }
  0xde   :  { %v1753_v36 = vpop.eup %1752  ;;  %1764 = vrsqrt.f32 %v2456_v18  ;;  %vm446_vm4 = vcmp.eq.f32.partialorder %v2429_v17, inf  ;;  %v449_v4 = vand.u32 2147483648, %v2429_v17  ;;  %vm448_vm5 = vcmp.eq.f32.partialorder %v2429_v17, 0.0 }
  0xdf   :  { %v377_v21 = vsel %vm376_vm14, %v2362_v53, %v375_v46  ;;  %v438_v27 = vmul.f32 %v1753_v36, %v2386_v41  ;;  %1766 = vrcp.f32 %v459_v40  ;;  %v464_v53 = vmax.f32 %v436_v48, 1e-12  ;;  %v879_v40 = vpop.permute.xlu0 %878 }
  0xe0   :  { %v1755_v8 = vpop.eup %1754  ;;  %v380_v58 = vsel %vm378_vm13, %v379_v34, %v377_v21  ;;  %vm390_vm6 = vcmp.eq.f32.partialorder %v2456_v18, inf  ;;  %vm1820_vm8 = vmmov 1  }
  0xe1   :  { %1626 = vmatpush3.bf16.xpose.msk.msra.mxu0 %vm2202_vm10, %v2347_v3  ;;  %1652 = vmatpush3.bf16.xpose.msk.msra.mxu1 %vm2202_vm10, %v2347_v3  ;;  %v422_v3 = vsel %vm420_vm3, %v421_v20, %v419_v59  ;;  %v429_v20 = vsel %vm427_vm7, %v428_v23, %v426_v37  ;;  %v440_v50 = vsel %vm439_vm15, %v2386_v41, %v438_v27  ;;  %vm385_vm3 = vcmp.eq.f32.partialorder %v2412_v26, 0.0  ;;  %v1757_v23 = vpop.eup %1756 }
  0xe2   :  { %1629 = vmatprep.subr.msk.bf16.mxu0 %vm2202_vm10, %v2392_v30  ;;  %1645 = vmatprep.subr.msk.bf16.mxu1 %vm2202_vm10, %v2392_v30  ;;  %v462_v9 = vmax.f32 %v422_v3, 1e-12  ;;  %v463_v57 = vmax.f32 %v429_v20, 1e-12  ;;  %v443_v6 = vsel %vm441_vm1, %v442_v16, %v440_v50  ;;  %v382_v10 = vmul.f32 %v1755_v8, %v2412_v26 }
  0xe3   :  { %v456_v41 = vmax.f32 %v380_v58, 1e-12  ;;  %v465_v29 = vmax.f32 %v443_v6, 1e-12  ;;  %v393_v59 = vand.u32 2147483648, %v2456_v18  ;;  %vm392_vm7 = vcmp.eq.f32.partialorder %v2456_v18, 0.0 }
  0xe4   :  { %1768 = vrcp.f32 %v462_v9  ;;  %v384_v2 = vsel %vm383_vm2, %v2412_v26, %v382_v10  ;;  %v486_v46 = vmul.f32 %v1757_v23, %v1998_v56 }
  0xe5   :  { %v1759_v22 = vpop.eup %1758  ;;  %1770 = vrcp.f32 %v454_v31  ;;  %v387_v28 = vsel %vm385_vm3, %v386_v13, %v384_v2 }
  0xe6   :  { %1772 = vrcp.f32 %v463_v57  ;;  %v457_v51 = vmax.f32 %v387_v28, 1e-12  ;;  %v488_v45 = vmul.f32 %v1759_v22, %v2007_v60 }
  0xe7   :  { %1774 = vrcp.f32 %v455_v39 }
  0xe8   :  { %1776 = vrcp.f32 %v464_v53 }
  0xe9   :  { %1632 = vmatpush3.bf16.xpose.msk.msra.mxu0 %vm2202_vm10, %v2392_v30  ;;  %1653 = vmatpush3.bf16.xpose.msk.msra.mxu1 %vm2202_vm10, %v2392_v30  ;;  %v1761_v30 = vpop.eup %1760  ;;  %1778 = vrcp.f32 %v456_v41 }
  0xea   :  { %1635 = vmatprep.subr.msk.bf16.mxu0 %vm2202_vm10, %v2414_v38  ;;  %1646 = vmatprep.subr.msk.bf16.mxu1 %vm2202_vm10, %v2414_v38  ;;  %v445_v47 = vmul.f32 %v1761_v30, %v2429_v17  ;;  %v1763_v52 = vpop.eup %1762  ;;  %1780 = vrcp.f32 %v465_v29 }
  0xeb   :  { %v1765_v62 = vpop.eup %1764  ;;  %1782 = vrcp.f32 %v457_v51  ;;  %v472_v35 = vmul.f32 %v1763_v52, %v2012_v61 }
  0xec   :  { %v447_v63 = vsel %vm446_vm4, %v2429_v17, %v445_v47  ;;  %v389_v12 = vmul.f32 %v1765_v62, %v2456_v18  ;;  %v1767_v49 = vpop.eup %1766 }
  0xed   :  { %v450_v26 = vsel %vm448_vm5, %v449_v4, %v447_v63  ;;  %v484_v37 = vmul.f32 %v1767_v49, %v1991_v54 }
  0xee   :  { %v466_v44 = vmax.f32 %v450_v26, 1e-12  ;;  %v391_v17 = vsel %vm390_vm6, %v2456_v18, %v389_v12  ;;  %v1769_v34 = vpop.eup %1768  ;;  %v1794_v18 = vld [vmem:[%s2886_s1 + $0x8] sm:$0xff] }
  0xef   :  { %v394_v0 = vsel %vm392_vm7, %v393_v59, %v391_v17  ;;  %v1771_v55 = vpop.eup %1770  ;;  %1579 = vmatprep.mubr.msk.f32.mxu1 %vm66_vm0, %v484_v37  ;;  %v470_v54 = vmul.f32 %v1794_v18, %v2458_v11  ;;  %v490_v21 = vmul.f32 %v1769_v34, %v2023_v5 }
  0xf0   :  { %1784 = vrcp.f32 %v466_v44  ;;  %v458_v3 = vmax.f32 %v394_v0, 1e-12  ;;  %v1773_v19 = vpop.eup %1772  ;;  %v474_v56 = vmul.f32 %v1771_v55, %v2028_v7 }
  0xf1   :  { %1638 = vmatpush3.bf16.xpose.msk.msra.mxu0 %vm2202_vm10, %v2414_v38  ;;  %1654 = vmatpush3.bf16.xpose.msk.msra.mxu1 %vm2202_vm10, %v2414_v38  ;;  %v1775_v38 = vpop.eup %1774  ;;  %v492_v16 = vmul.f32 %v1773_v19, %v2039_v14 }
  0xf2   :  { %1786 = vrcp.f32 %v458_v3  ;;  %v1777_v36 = vpop.eup %1776  ;;  %v476_v60 = vmul.f32 %v1775_v38, %v2044_v15 }
  0xf3   :  { %v1779_v20 = vpop.eup %1778  ;;  %v494_v7 = vmul.f32 %v1777_v36, %v2055_v24  ;;  %v741_v24 = vlaneseq }
  0xf4   :  { %v1781_v61 = vpop.eup %1780  ;;  %v478_v9 = vmul.f32 %v1779_v20, %v2060_v25 }
  0xf5   :  { %v1783_v11 = vpop.eup %1782  ;;  %v496_v15 = vmul.f32 %v1781_v61, %v2071_v32  ;;  %v777_v32 = vand.u32 127, %v741_v24 }
  0xf6   :  { %v480_v5 = vmul.f32 %v1783_v11, %v2076_v33  ;;  %v2570_v33 = vshrl.u32 %v741_v24, 7 }
  0xf8   :  { %1568 = vmatmul.mubr.msk.f32.vlgmr.msra.gmra.mrb[0].mxu0 %vm66_vm0, %v470_v54  ;;  %1580 = vmatmul.mubr.msk.f32.vlgmr.msra.gmra.mrb[0].mxu1 %vm66_vm0, %v486_v46  ;;  %vm780_vm10 = vcmp.eq.s32.totalorder %v2570_v33, %v777_v32  ;;  %v2581_v19 = vadd.s32 8, %v2570_v33  ;;  %v2590_v38 = vadd.s32 32, %v2570_v33  ;;  %v2593_v36 = vadd.s32 40, %v2570_v33 }
  0xf9   :  { %1570 = vmatprep.mubr.msk.f32.mxu0 %vm66_vm0, %v472_v35  ;;  %1582 = vmatprep.mubr.msk.f32.mxu1 %vm66_vm0, %v488_v45  ;;  %vm945_vm9 = vmxor %vm780_vm10, %vm1820_vm8  ;;  %v2584_v35 = vadd.s32 16, %v2570_v33  ;;  %v2587_v45 = vadd.s32 24, %v2570_v33  ;;  %v2596_v20 = vadd.s32 48, %v2570_v33  ;;  %v2605_v61 = vadd.s32 72, %v2570_v33 }
  0xfa   :  { %v1785_v1 = vpop.eup %1784 }
  0xfb   :  { %v498_v25 = vmul.f32 %v1785_v1, %v2087_v42  ;;  %v2619_v1 = vadd.s32 104, %v2570_v33 }
  0xfc   :  { %1571 = vmatmul.mubr.msk.f32.gmra.mrb[2].mxu0 %vm66_vm0, %v474_v56  ;;  %1583 = vmatmul.mubr.msk.f32.gmra.mrb[2].mxu1 %vm66_vm0, %v490_v21  ;;  %v1787_v27 = vpop.eup %1786  ;;  %v2599_v56 = vadd.s32 56, %v2570_v33  ;;  %v2602_v21 = vadd.s32 64, %v2570_v33 }
  0xfd   :  { %1573 = vmatprep.mubr.msk.f32.mxu0 %vm66_vm0, %v476_v60  ;;  %1585 = vmatprep.mubr.msk.f32.mxu1 %vm66_vm0, %v492_v16  ;;  %v482_v14 = vmul.f32 %v1787_v27, %v2092_v43  ;;  %v1470_v43 = vld [vmem:[%s2887_s2] ss:$0 sm:$0xff]  ;;  %v2608_v60 = vadd.s32 80, %v2570_v33  ;;  %s1822_s2 = smov [#allocation6]  }
  0xfe   :  { %vm929_vm11 = vcmp.eq.s32.totalorder %v879_v40, %v1470_v43  ;;  %s1430_s29 = sshll.u32 %s1822_s2, 4  ;;  %s1431_s29 = int_to_ptr.vmem [resolvable:$true] %s1430_s29 }
  0xff   :  { %vm961_vm12 = vmand %vm929_vm11, %vm945_vm9  ;;  %s1795_s30 = scalar_lea.vmem %s1431_s29, 64  ;;  %p1800_p1 = scmp.lt.s32.totalorder %s1431_s29, %s1431_s29 }
 0x100   :  { %1574 = vmatmul.mubr.msk.f32.gmra.mrb[4].mxu0 %vm66_vm0, %v478_v9  ;;  %1586 = vmatmul.mubr.msk.f32.gmra.mrb[4].mxu1 %vm66_vm0, %v494_v7  ;;  %v2613_v9 = vadd.s32 88, %v2570_v33  ;;  %v2616_v7 = vadd.s32 96, %v2570_v33  ;;  %p1796_p0 = scmp.ne.s32.totalorder %s1431_s29, %s1795_s30  ;;  %p1801_p2 = scmp.lt.s32.totalorder %s1795_s30, %s1795_s30 }
 0x101   :  { %1576 = vmatprep.mubr.msk.f32.mxu0 %vm66_vm0, %v480_v5  ;;  %1588 = vmatprep.mubr.msk.f32.mxu1 %vm66_vm0, %v496_v15  ;;  %v2622_v5 = vadd.s32 112, %v2570_v33  ;;  %v2625_v15 = vadd.s32 120, %v2570_v33 }
 0x102   :  { %p1802_p3 = por %p1801_p2, %p1800_p1 }
 0x104   :  { %1577 = vmatmul.mubr.msk.f32.gmra.mrb[6].mxu0 %vm66_vm0, %v482_v14  ;;  %1589 = vmatmul.mubr.msk.f32.gmra.mrb[6].mxu1 %vm66_vm0, %v498_v25  ;;  %p1803_p4 = pnand %p1802_p3, %p1796_p0 }
 0x1cb   :  { %v1569_v42 = vpop.f32.mrb[0].mxu0  ;;  %v1581_v31 = vpop.f32.mrb[0].mxu1 }
 0x1cc   :  { %v661_v48 = vpop.f32.mrb[1].mxu0  ;;  %v701_v13 = vpop.f32.mrb[1].mxu1 }
 0x1cd   :  { %v2576_v8 = vsel %vm780_vm10, -1.0, %v661_v48 }
 0x1ce   :  { %v993_v57 = vsel %vm961_vm12, %v2576_v8, -1.0  ;;  %v1186_v58 = vsel %vm961_vm12, -1.0, %v2576_v8 }
 0x1cf   :  { %vm1009_vm0 = vcmp.gt.f32.partialorder %v993_v57, 0.9999  ;;  %v1202_v50 = vmax.f32 %v1186_v58, -1.0  ;;  %v1572_v39 = vpop.f32.mrb[2].mxu0  ;;  %v1584_v6 = vpop.f32.mrb[2].mxu1 }
 0x1d0   :  { %v1025_v10 = vsel %vm1009_vm0, 1.0, %v993_v57  ;;  %v671_v23 = vpop.f32.mrb[3].mxu0  ;;  %v711_v53 = vpop.f32.mrb[3].mxu1 }
 0x1d1   :  { %v1041_v22 = vmax.f32 %v1025_v10, -1.0  ;;  %v1206_v41 = vmax.f32 %v1202_v50, -1.0 }
 0x1d3   :  { %v1045_v2 = vmax.f32 %v1041_v22, -1.0  ;;  %v1210_v30 = vmax.f32 %v1206_v41, -1.0  ;;  %v1575_v29 = vpop.f32.mrb[4].mxu0  ;;  %v1587_v28 = vpop.f32.mrb[4].mxu1 }
 0x1d4   :  { %v681_v4 = vpop.f32.mrb[5].mxu0  ;;  %v721_v51 = vpop.f32.mrb[5].mxu1 }
 0x1d5   :  { %v1049_v47 = vmax.f32 %v1045_v2, -1.0  ;;  %v1214_v52 = vmax.f32 %v1210_v30, -1.0 }
 0x1d7   :  { %v1053_v62 = vmax.f32 %v1049_v47, -1.0  ;;  %v1216_v63 = vmax.f32 %v1214_v52, -1.0  ;;  %v1578_v59 = vpop.f32.mrb[6].mxu0  ;;  %v1590_v26 = vpop.f32.mrb[6].mxu1 }
 0x1d8   :  { %v691_v12 = vpop.f32.mrb[7].mxu0  ;;  %v731_v44 = vpop.f32.mrb[7].mxu1 }
 0x1d9   :  { %v1055_v49 = vmax.f32 %v1053_v62, -1.0  ;;  %v1217_v17 = vrot.slane %v1216_v63, 4 }
 0x1db   :  { %v1056_v0 = vrot.slane %v1055_v49, 4  ;;  %v1218_v37 = vmax.f32 %v1216_v63, %v1217_v17 }
 0x1dd   :  { %v1057_v34 = vmax.f32 %v1055_v49, %v1056_v0  ;;  %v1219_v3 = vrot.slane %v1218_v37, 2 }
 0x1df   :  { %v1058_v55 = vrot.slane %v1057_v34, 2  ;;  %v1220_v46 = vmax.f32 %v1218_v37, %v1219_v3 }
 0x1e1   :  { %v1059_v18 = vmax.f32 %v1057_v34, %v1058_v55  ;;  %v1221_v54 = vrot.slane %v1220_v46, 1 }
 0x1e3   :  { %v1060_v16 = vrot.slane %v1059_v18, 1  ;;  %v2610_v11 = vmax.f32 %v1220_v46, %v1221_v54 }
 0x1e5   :  { %v1061_v27 = vmax.f32 %v1059_v18, %v1060_v16  ;;  %vm1223_vm14 = vcmp.eq.f32.partialorder %v1186_v58, %v2610_v11  ;;  %vm1486_vm13 = vcmp.eq.f32.partialorder %v2610_v11, -1.0  ;;  %1353 = vst [vmem:[#allocation4] sm:$0x1] %v2610_v11 }
 0x1e6   :  { %v2631_v14 = vsel %vm1223_vm14, %v2570_v33, 1073741824  ;;  %v2636_v25 = vsel %vm1486_vm13, %v2581_v19, 1073741824  ;;  %v2641_v24 = vsel %vm1486_vm13, %v2584_v35, 1073741824  ;;  %v2646_v32 = vsel %vm1486_vm13, %v2587_v45, 1073741824 }
 0x1e7   :  { %vm1062_vm15 = vcmp.eq.f32.partialorder %v1025_v10, %v1061_v27  ;;  %vm1471_vm1 = vcmp.eq.f32.partialorder %v1061_v27, -1.0  ;;  %v2651_v43 = vsel %vm1486_vm13, %v2590_v38, 1073741824  ;;  %v2656_v40 = vsel %vm1486_vm13, %v2593_v36, 1073741824  ;;  %1351 = vst [vmem:[#allocation2] sm:$0x1] %v1061_v27 }
 0x1e8   :  { %v1078_v42 = vsel %vm1062_vm15, %v2570_v33, 1073741824  ;;  %v1079_v31 = vsel %vm1471_vm1, %v2581_v19, 1073741824  ;;  %v1080_v48 = vsel %vm1471_vm1, %v2584_v35, 1073741824  ;;  %v1081_v13 = vsel %vm1471_vm1, %v2587_v45, 1073741824 }
 0x1e9   :  { %v1082_v57 = vsel %vm1471_vm1, %v2590_v38, 1073741824  ;;  %v1083_v58 = vsel %vm1471_vm1, %v2593_v36, 1073741824  ;;  %v1084_v50 = vsel %vm1471_vm1, %v2596_v20, 1073741824  ;;  %v1085_v39 = vsel %vm1471_vm1, %v2599_v56, 1073741824 }
 0x1ea   :  { %v1086_v6 = vsel %vm1471_vm1, %v2602_v21, 1073741824  ;;  %v1087_v10 = vsel %vm1471_vm1, %v2605_v61, 1073741824  ;;  %v1088_v23 = vsel %vm1471_vm1, %v2608_v60, 1073741824  ;;  %v1089_v53 = vsel %vm1471_vm1, %v2613_v9, 1073741824 }
 0x1eb   :  { %v1090_v22 = vsel %vm1471_vm1, %v2616_v7, 1073741824  ;;  %v1091_v41 = vsel %vm1471_vm1, %v2619_v1, 1073741824  ;;  %v1092_v2 = vsel %vm1471_vm1, %v2622_v5, 1073741824  ;;  %v1093_v30 = vsel %vm1471_vm1, %v2625_v15, 1073741824 }
 0x1ec   :  { %vm1094_vm2 = vcmp.lt.s32.totalorder %v1078_v42, %v1082_v57  ;;  %vm1096_vm3 = vcmp.lt.s32.totalorder %v1079_v31, %v1083_v58  ;;  %vm1098_vm4 = vcmp.lt.s32.totalorder %v1080_v48, %v1084_v50  ;;  %vm1100_vm5 = vcmp.lt.s32.totalorder %v1081_v13, %v1085_v39 }
 0x1ed   :  { %v1095_v29 = vsel %vm1094_vm2, %v1078_v42, %v1082_v57  ;;  %v1097_v28 = vsel %vm1096_vm3, %v1079_v31, %v1083_v58  ;;  %v1099_v4 = vsel %vm1098_vm4, %v1080_v48, %v1084_v50  ;;  %v1101_v51 = vsel %vm1100_vm5, %v1081_v13, %v1085_v39 }
 0x1ee   :  { %vm1102_vm6 = vcmp.lt.s32.totalorder %v1095_v29, %v1086_v6  ;;  %vm1104_vm7 = vcmp.lt.s32.totalorder %v1097_v28, %v1087_v10  ;;  %vm1106_vm10 = vcmp.lt.s32.totalorder %v1099_v4, %v1088_v23  ;;  %vm1108_vm8 = vcmp.lt.s32.totalorder %v1101_v51, %v1089_v53 }
 0x1ef   :  { %v1103_v47 = vsel %vm1102_vm6, %v1095_v29, %v1086_v6  ;;  %v1105_v52 = vsel %vm1104_vm7, %v1097_v28, %v1087_v10  ;;  %v1107_v62 = vsel %vm1106_vm10, %v1099_v4, %v1088_v23  ;;  %v1109_v63 = vsel %vm1108_vm8, %v1101_v51, %v1089_v53 }
 0x1f0   :  { %vm1110_vm9 = vcmp.lt.s32.totalorder %v1103_v47, %v1090_v22  ;;  %vm1112_vm11 = vcmp.lt.s32.totalorder %v1105_v52, %v1091_v41  ;;  %vm1114_vm12 = vcmp.lt.s32.totalorder %v1107_v62, %v1092_v2  ;;  %vm1116_vm0 = vcmp.lt.s32.totalorder %v1109_v63, %v1093_v30 }
 0x1f1   :  { %v1111_v59 = vsel %vm1110_vm9, %v1103_v47, %v1090_v22  ;;  %v1113_v26 = vsel %vm1112_vm11, %v1105_v52, %v1091_v41  ;;  %v1115_v12 = vsel %vm1114_vm12, %v1107_v62, %v1092_v2  ;;  %v1117_v44 = vsel %vm1116_vm0, %v1109_v63, %v1093_v30 }
 0x1f2   :  { %vm1118_vm14 = vcmp.lt.s32.totalorder %v1111_v59, %v1113_v26  ;;  %vm1120_vm15 = vcmp.lt.s32.totalorder %v1115_v12, %v1117_v44  ;;  %v1245_v49 = vsel %vm1486_vm13, %v2596_v20, 1073741824  ;;  %v1246_v17 = vsel %vm1486_vm13, %v2599_v56, 1073741824 }
 0x1f3   :  { %v1119_v0 = vsel %vm1118_vm14, %v1111_v59, %v1113_v26  ;;  %v1121_v37 = vsel %vm1120_vm15, %v1115_v12, %v1117_v44  ;;  %v1247_v34 = vsel %vm1486_vm13, %v2602_v21, 1073741824  ;;  %v1248_v3 = vsel %vm1486_vm13, %v2605_v61, 1073741824 }
 0x1f4   :  { %vm1122_vm1 = vcmp.lt.s32.totalorder %v1119_v0, %v1121_v37  ;;  %v1249_v55 = vsel %vm1486_vm13, %v2608_v60, 1073741824  ;;  %v1250_v46 = vsel %vm1486_vm13, %v2613_v9, 1073741824  ;;  %v1251_v18 = vsel %vm1486_vm13, %v2616_v7, 1073741824 }
 0x1f5   :  { %v1123_v54 = vsel %vm1122_vm1, %v1119_v0, %v1121_v37  ;;  %v1252_v16 = vsel %vm1486_vm13, %v2619_v1, 1073741824  ;;  %v1253_v27 = vsel %vm1486_vm13, %v2622_v5, 1073741824  ;;  %v1254_v42 = vsel %vm1486_vm13, %v2625_v15, 1073741824 }
 0x1f6   :  { %v1124_v31 = vrot.slane %v1123_v54, 4  ;;  %vm1255_vm2 = vcmp.lt.s32.totalorder %v2631_v14, %v2651_v43  ;;  %vm1257_vm3 = vcmp.lt.s32.totalorder %v2636_v25, %v2656_v40  ;;  %vm1259_vm4 = vcmp.lt.s32.totalorder %v2641_v24, %v1245_v49 }
 0x1f7   :  { %v1256_v48 = vsel %vm1255_vm2, %v2631_v14, %v2651_v43  ;;  %v1258_v13 = vsel %vm1257_vm3, %v2636_v25, %v2656_v40  ;;  %v1260_v57 = vsel %vm1259_vm4, %v2641_v24, %v1245_v49  ;;  %vm1261_vm5 = vcmp.lt.s32.totalorder %v2646_v32, %v1246_v17 }
 0x1f8   :  { %vm1125_vm13 = vcmp.lt.s32.totalorder %v1123_v54, %v1124_v31  ;;  %v1262_v11 = vsel %vm1261_vm5, %v2646_v32, %v1246_v17  ;;  %vm1263_vm6 = vcmp.lt.s32.totalorder %v1256_v48, %v1247_v34  ;;  %vm1265_vm7 = vcmp.lt.s32.totalorder %v1258_v13, %v1248_v3 }
 0x1f9   :  { %v1126_v58 = vsel %vm1125_vm13, %v1123_v54, %v1124_v31  ;;  %v1264_v50 = vsel %vm1263_vm6, %v1256_v48, %v1247_v34  ;;  %v1266_v39 = vsel %vm1265_vm7, %v1258_v13, %v1248_v3  ;;  %vm1267_vm10 = vcmp.lt.s32.totalorder %v1260_v57, %v1249_v55 }
 0x1fa   :  { %v1127_v6 = vrot.slane %v1126_v58, 2  ;;  %v1268_v10 = vsel %vm1267_vm10, %v1260_v57, %v1249_v55  ;;  %vm1269_vm8 = vcmp.lt.s32.totalorder %v1262_v11, %v1250_v46  ;;  %vm1271_vm9 = vcmp.lt.s32.totalorder %v1264_v50, %v1251_v18 }
 0x1fb   :  { %v1270_v14 = vsel %vm1269_vm8, %v1262_v11, %v1250_v46  ;;  %v1272_v43 = vsel %vm1271_vm9, %v1264_v50, %v1251_v18  ;;  %vm1273_vm11 = vcmp.lt.s32.totalorder %v1266_v39, %v1252_v16  ;;  %vm1275_vm12 = vcmp.lt.s32.totalorder %v1268_v10, %v1253_v27 }
 0x1fc   :  { %vm1128_vm0 = vcmp.lt.s32.totalorder %v1126_v58, %v1127_v6  ;;  %v1274_v25 = vsel %vm1273_vm11, %v1266_v39, %v1252_v16  ;;  %v1276_v24 = vsel %vm1275_vm12, %v1268_v10, %v1253_v27  ;;  %vm1277_vm14 = vcmp.lt.s32.totalorder %v1270_v14, %v1254_v42 }
 0x1fd   :  { %v1129_v40 = vsel %vm1128_vm0, %v1126_v58, %v1127_v6  ;;  %v1278_v32 = vsel %vm1277_vm14, %v1270_v14, %v1254_v42  ;;  %vm1279_vm15 = vcmp.lt.s32.totalorder %v1272_v43, %v1274_v25  ;;  %v1821_v30 = vmov 0.0  }
 0x1fe   :  { %v1130_v23 = vrot.slane %v1129_v40, 1  ;;  %vm1281_vm1 = vcmp.lt.s32.totalorder %v1276_v24, %v1278_v32  ;;  %v1280_v22 = vsel %vm1279_vm15, %v1272_v43, %v1274_v25 }
 0x1ff   :  { %v1282_v41 = vsel %vm1281_vm1, %v1276_v24, %v1278_v32 }
 0x200   :  { %vm1131_vm2 = vcmp.lt.s32.totalorder %v1129_v40, %v1130_v23  ;;  %vm1283_vm5 = vcmp.lt.s32.totalorder %v1280_v22, %v1282_v41 }
 0x201   :  { %v2731_v53 = vsel %vm1131_vm2, %v1129_v40, %v1130_v23  ;;  %v1284_v28 = vsel %vm1283_vm5, %v1280_v22, %v1282_v41 }
 0x202   :  { %vm1133_vm3 = vcmp.eq.s32.totalorder %v2570_v33, %v2731_v53  ;;  %vm1134_vm4 = vcmp.eq.s32.totalorder %v2581_v19, %v2731_v53  ;;  %vm1135_vm13 = vcmp.eq.s32.totalorder %v2584_v35, %v2731_v53  ;;  %vm1136_vm6 = vcmp.eq.s32.totalorder %v2587_v45, %v2731_v53 }
 0x203   :  { %v1149_v2 = vsel %vm1133_vm3, %v2576_v8, 0.0  ;;  %v1150_v29 = vsel %vm1134_vm4, -1.0, %v1821_v30  ;;  %v1285_v51 = vrot.slane %v1284_v28, 4  ;;  %v1151_v47 = vsel %vm1135_vm13, -1.0, %v1821_v30 }
 0x204   :  { %v1165_v4 = vadd.f32 %v1150_v29, %v1149_v2  ;;  %vm1137_vm7 = vcmp.eq.s32.totalorder %v2590_v38, %v2731_v53  ;;  %v1152_v62 = vsel %vm1136_vm6, -1.0, %v1821_v30  ;;  %vm1138_vm8 = vcmp.eq.s32.totalorder %v2593_v36, %v2731_v53 }
 0x205   :  { %vm1286_vm10 = vcmp.lt.s32.totalorder %v1284_v28, %v1285_v51  ;;  %v1153_v12 = vsel %vm1137_vm7, -1.0, %v1821_v30  ;;  %vm1139_vm9 = vcmp.eq.s32.totalorder %v2596_v20, %v2731_v53  ;;  %v1154_v49 = vsel %vm1138_vm8, -1.0, %v1821_v30 }
 0x206   :  { %v1166_v52 = vadd.f32 %v1165_v4, %v1151_v47  ;;  %v1287_v63 = vsel %vm1286_vm10, %v1284_v28, %v1285_v51  ;;  %vm1140_vm12 = vcmp.eq.s32.totalorder %v2599_v56, %v2731_v53  ;;  %v1155_v34 = vsel %vm1139_vm9, -1.0, %v1821_v30 }
 0x207   :  { %v1288_v26 = vrot.slane %v1287_v63, 2  ;;  %vm1141_vm0 = vcmp.eq.s32.totalorder %v2602_v21, %v2731_v53  ;;  %v1156_v55 = vsel %vm1140_vm12, -1.0, %v1821_v30  ;;  %vm1142_vm15 = vcmp.eq.s32.totalorder %v2605_v61, %v2731_v53 }
 0x208   :  { %v1167_v59 = vadd.f32 %v1166_v52, %v1152_v62  ;;  %v1157_v54 = vsel %vm1141_vm0, -1.0, %v1821_v30  ;;  %vm1143_vm1 = vcmp.eq.s32.totalorder %v2608_v60, %v2731_v53  ;;  %v1158_v27 = vsel %vm1142_vm15, -1.0, %v1821_v30 }
 0x209   :  { %vm1289_vm11 = vcmp.lt.s32.totalorder %v1287_v63, %v1288_v26  ;;  %vm1144_vm4 = vcmp.eq.s32.totalorder %v2613_v9, %v2731_v53  ;;  %v1159_v31 = vsel %vm1143_vm1, -1.0, %v1821_v30  ;;  %vm1145_vm5 = vcmp.eq.s32.totalorder %v2616_v7, %v2731_v53 }
 0x20a   :  { %v1168_v44 = vadd.f32 %v1167_v59, %v1153_v12  ;;  %v1290_v17 = vsel %vm1289_vm11, %v1287_v63, %v1288_v26  ;;  %v1160_v11 = vsel %vm1144_vm4, -1.0, %v1821_v30  ;;  %vm1146_vm6 = vcmp.eq.s32.totalorder %v2619_v1, %v2731_v53 }
 0x20b   :  { %v1291_v37 = vrot.slane %v1290_v17, 1  ;;  %vm1147_vm10 = vcmp.eq.s32.totalorder %v2622_v5, %v2731_v53  ;;  %v1162_v39 = vsel %vm1146_vm6, -1.0, %v1821_v30  ;;  %vm1148_vm9 = vcmp.eq.s32.totalorder %v2625_v15, %v2731_v53 }
 0x20c   :  { %v1169_v0 = vadd.f32 %v1168_v44, %v1154_v49  ;;  %v1164_v24 = vsel %vm1148_vm9, -1.0, %v1821_v30 }
 0x20d   :  { %vm1292_vm14 = vcmp.lt.s32.totalorder %v1290_v17, %v1291_v37 }
 0x20e   :  { %v1170_v3 = vadd.f32 %v1169_v0, %v1155_v34  ;;  %v2761_v18 = vsel %vm1292_vm14, %v1290_v17, %v1291_v37 }
 0x20f   :  { %vm1294_vm2 = vcmp.eq.s32.totalorder %v2570_v33, %v2761_v18  ;;  %vm1295_vm3 = vcmp.eq.s32.totalorder %v2581_v19, %v2761_v18  ;;  %vm1296_vm13 = vcmp.eq.s32.totalorder %v2584_v35, %v2761_v18  ;;  %v1161_v19 = vsel %vm1145_vm5, -1.0, %v1821_v30 }
 0x210   :  { %v1171_v46 = vadd.f32 %v1170_v3, %v1156_v55  ;;  %v1310_v13 = vsel %vm1294_vm2, %v2576_v8, 0.0  ;;  %v1311_v57 = vsel %vm1295_vm3, -1.0, %v1821_v30  ;;  %vm1297_vm7 = vcmp.eq.s32.totalorder %v2587_v45, %v2761_v18  ;;  %v1378_v55 = vld [vmem:[#allocation2] sm:$0x1] }
 0x211   :  { %v1326_v58 = vadd.f32 %v1311_v57, %v1310_v13  ;;  %v1312_v50 = vsel %vm1296_vm13, -1.0, %v1821_v30  ;;  %vm1298_vm8 = vcmp.eq.s32.totalorder %v2590_v38, %v2761_v18  ;;  %v1313_v10 = vsel %vm1297_vm7, -1.0, %v1821_v30 }
 0x212   :  { %v1172_v16 = vadd.f32 %v1171_v46, %v1157_v54  ;;  %v1163_v45 = vsel %vm1147_vm10, -1.0, %v1821_v30  ;;  %vm1299_vm11 = vcmp.eq.s32.totalorder %v2593_v36, %v2761_v18  ;;  %v1314_v25 = vsel %vm1298_vm8, -1.0, %v1821_v30 }
 0x213   :  { %v1327_v35 = vadd.f32 %v1326_v58, %v1312_v50  ;;  %vm1300_vm12 = vcmp.eq.s32.totalorder %v2596_v20, %v2761_v18  ;;  %v1315_v32 = vsel %vm1299_vm11, -1.0, %v1821_v30  ;;  %vm1301_vm0 = vcmp.eq.s32.totalorder %v2599_v56, %v2761_v18 }
 0x214   :  { %v1173_v42 = vadd.f32 %v1172_v16, %v1158_v27  ;;  %v1316_v36 = vsel %vm1300_vm12, -1.0, %v1821_v30  ;;  %vm1302_vm14 = vcmp.eq.s32.totalorder %v2602_v21, %v2761_v18  ;;  %v1317_v2 = vsel %vm1301_vm0, -1.0, %v1821_v30 }
 0x215   :  { %v1328_v14 = vadd.f32 %v1327_v35, %v1313_v10  ;;  %vm1303_vm15 = vcmp.eq.s32.totalorder %v2605_v61, %v2761_v18  ;;  %v1318_v28 = vsel %vm1302_vm14, -1.0, %v1821_v30  ;;  %vm1304_vm1 = vcmp.eq.s32.totalorder %v2608_v60, %v2761_v18 }
 0x216   :  { %v1174_v48 = vadd.f32 %v1173_v42, %v1159_v31  ;;  %v1319_v51 = vsel %vm1303_vm15, -1.0, %v1821_v30  ;;  %vm1305_vm2 = vcmp.eq.s32.totalorder %v2613_v9, %v2761_v18  ;;  %v1320_v52 = vsel %vm1304_vm1, -1.0, %v1821_v30 }
 0x217   :  { %v1329_v38 = vadd.f32 %v1328_v14, %v1314_v25  ;;  %vm1306_vm3 = vcmp.eq.s32.totalorder %v2616_v7, %v2761_v18  ;;  %v1321_v63 = vsel %vm1305_vm2, -1.0, %v1821_v30  ;;  %vm1307_vm4 = vcmp.eq.s32.totalorder %v2619_v1, %v2761_v18 }
 0x218   :  { %v1175_v33 = vadd.f32 %v1174_v48, %v1160_v11  ;;  %v1322_v59 = vsel %vm1306_vm3, -1.0, %v1821_v30  ;;  %vm1308_vm5 = vcmp.eq.s32.totalorder %v2622_v5, %v2761_v18  ;;  %v1323_v26 = vsel %vm1307_vm4, -1.0, %v1821_v30 }
 0x219   :  { %v1330_v23 = vadd.f32 %v1329_v38, %v1315_v32  ;;  %vm1309_vm13 = vcmp.eq.s32.totalorder %v2625_v15, %v2761_v18  ;;  %v1324_v12 = vsel %vm1308_vm5, -1.0, %v1821_v30  ;;  %vm1382_vm6 = vcmp.gt.f32.partialorder %v1378_v55, -1.0  ;;  %v1379_v15 = vld [vmem:[#allocation4] sm:$0x1] }
 0x21a   :  { %v1176_v8 = vadd.f32 %v1175_v33, %v1161_v19  ;;  %v1325_v49 = vsel %vm1309_vm13, -1.0, %v1821_v30  ;;  %vm1383_vm7 = vcmp.lt.f32.partialorder %v1378_v55, 1.0  ;;  %vm1385_vm8 = vcmp.gt.f32.partialorder %v1379_v15, -1.0 }
 0x21b   :  { %v1331_v22 = vadd.f32 %v1330_v23, %v1316_v36  ;;  %vm1384_vm10 = vmand %vm1382_vm6, %vm1383_vm7  ;;  %vm1387_vm11 = vcmp.lt.f32.partialorder %v1379_v15, 1.0 }
 0x21c   :  { %v1177_v6 = vadd.f32 %v1176_v8, %v1162_v39  ;;  %vm1386_vm9 = vmand %vm1384_vm10, %vm1385_vm8 }
 0x21d   :  { %v1332_v20 = vadd.f32 %v1331_v22, %v1317_v2  ;;  %vm2831_vm12 = vmand %vm1386_vm9, %vm1387_vm11 }
 0x21e   :  { %v1178_v43 = vadd.f32 %v1177_v6, %v1163_v45 }
 0x21f   :  { %v1333_v56 = vadd.f32 %v1332_v20, %v1318_v28 }
 0x220   :  { %v1179_v40 = vadd.f32 %v1178_v43, %v1164_v24 }
 0x221   :  { %v1334_v21 = vadd.f32 %v1333_v56, %v1319_v51 }
 0x222   :  { %v1180_v53 = vrot.slane %v1179_v40, 4 }
 0x223   :  { %v1335_v61 = vadd.f32 %v1334_v21, %v1320_v52 }
 0x224   :  { %v1181_v41 = vadd.f32 %v1180_v53, %v1179_v40 }
 0x225   :  { %v1336_v60 = vadd.f32 %v1335_v61, %v1321_v63 }
 0x226   :  { %v1182_v29 = vrot.slane %v1181_v41, 2 }
 0x227   :  { %v1337_v9 = vadd.f32 %v1336_v60, %v1322_v59 }
 0x228   :  { %v1183_v4 = vadd.f32 %v1182_v29, %v1181_v41 }
 0x229   :  { %v1338_v7 = vadd.f32 %v1337_v9, %v1323_v26 }
 0x22a   :  { %v1184_v47 = vrot.slane %v1183_v4, 1 }
 0x22b   :  { %v1339_v44 = vadd.f32 %v1338_v7, %v1324_v12 }
 0x22c   :  { %v1185_v62 = vadd.f32 %v1184_v47, %v1183_v4 }
 0x22d   :  { %v1340_v1 = vadd.f32 %v1339_v44, %v1325_v49 }
 0x22e   :  { %1352 = vst [vmem:[#allocation3] sm:$0x1] %v1185_v62 }
 0x22f   :  { %v1341_v0 = vrot.slane %v1340_v1, 4 }
 0x231   :  { %v1342_v37 = vadd.f32 %v1341_v0, %v1340_v1 }
 0x233   :  { %v1343_v34 = vrot.slane %v1342_v37, 2 }
 0x235   :  { %v1380_v17 = vld [vmem:[#allocation3] sm:$0x1]  ;;  %v1344_v3 = vadd.f32 %v1343_v34, %v1342_v37 }
 0x236   :  { %1420 = vst [vmem:[#allocation6] sm:$0x1] %v1380_v17  ;;  %v1398_v54 = vmul.f32 10.0, %v1380_v17 }
 0x237   :  { %v1345_v5 = vrot.slane %v1344_v3, 1 }
 0x239   :  { %v1346_v46 = vadd.f32 %v1345_v5, %v1344_v3 }
 0x23b   :  { %1354 = vst [vmem:[#allocation5] sm:$0x1] %v1346_v46 }
 0x242   :  { %v1381_v18 = vld [vmem:[#allocation5] sm:$0x1] }
 0x243   :  { %vm1389_vm0 = vcmp.gt.f32.partialorder %v1381_v18, %v1380_v17  ;;  %vm1390_vm14 = vcmp.gt.f32.partialorder %v1381_v18, 0.8  ;;  %vm1393_vm15 = vcmp.lt.f32.partialorder %v1381_v18, %v1380_v17  ;;  %1421 = vst [vmem:[#allocation6 + $0x1] sm:$0x1] %v1381_v18  ;;  %v1399_v42 = vmul.f32 10.0, %v1381_v18 }
 0x244   :  { %vm2835_vm1 = vmor %vm1389_vm0, %vm1390_vm14  ;;  %vm1394_vm3 = vcmp.lt.f32.partialorder %v1381_v18, 0.8 }
 0x245   :  { %vm1392_vm2 = vmand %vm2835_vm1, %vm2831_vm12  ;;  %v1400_v48 = vmax.f32 %v1398_v54, %v1399_v42 }
 0x246   :  { %vm2843_vm4 = vmand %vm1393_vm15, %vm1394_vm3  ;;  %v1501_v13 = vsel %vm1392_vm2, 1.0, %v1821_v30 }
 0x247   :  { %vm1396_vm5 = vmand %vm2843_vm4, %vm2831_vm12  ;;  %v1401_v57 = vsub.f32 %v1398_v54, %v1400_v48  ;;  %v1404_v11 = vsub.f32 %v1399_v42, %v1400_v48 }
 0x248   :  { %v1502_v33 = vsel %vm1396_vm5, 1.0, %v1821_v30  ;;  %v1412_v30 = vsel %vm1392_vm2, %v1381_v18, 0.0 }
 0x249   :  { %v1419_v19 = vadd.f32 %v1502_v33, %v1501_v13  ;;  %v1402_v58 = vmul.f32 1.442695, %v1401_v57  ;;  %v1405_v8 = vmul.f32 1.442695, %v1404_v11 }
 0x24b   :  { %1423 = vst [vmem:[#allocation6 + $0x3] sm:$0x1] %v1419_v19  ;;  %1788 = vpow2.f32 %v1402_v58 }
 0x24c   :  { %1790 = vpow2.f32 %v1405_v8 }
 0x255   :  { %v1789_v50 = vpop.eup %1788 }
 0x256   :  { %v1791_v39 = vpop.eup %1790 }
 0x257   :  { %v1407_v35 = vadd.f32 %v1791_v39, %v1789_v50 }
 0x259   :  { %1792 = vlog2.f32 %v1407_v35 }
 0x263   :  { %v1793_v6 = vpop.eup %1792 }
 0x264   :  { %v1409_v10 = vmul.f32 0.6931472, %v1793_v6 }
 0x266   :  { %v1410_v45 = vadd.f32 %v1409_v10, %v1400_v48 }
 0x268   :  { %v1411_v14 = vsub.f32 %v1410_v45, %v1398_v54 }
 0x26a   :  { %v1413_v43 = vsel %vm1396_vm5, %v1411_v14, 0.0 }
 0x26b   :  { %v1414_v25 = vadd.f32 %v1413_v43, %v1412_v30 }
 0x26d   :  { %1422 = vst [vmem:[#allocation6 + $0x2] sm:$0x1] %v1414_v25 }
 0x26e   :  { %1806 = shalt.err (!%p1803_p4)
}
 0x26f   :  { %s1807_s7 = scalar_lea.hbm %s2889_s4, 64 }
 0x270   :  { %p1808_p5 = scmp.ne.s32.totalorder %s2889_s4, %s1807_s7  ;;  %p1811_p6 = scmp.lt.u32.totalorder %s1807_s7, %s2889_s4 }
 0x272   :  { %p1813_p7 = pnand %p1811_p6, %p1808_p5 }
 0x274   :  { %1816 = shalt.err (!%p1813_p7)
}
 0x275   :  { %1433 = dma.vmem_to_hbm [thread:$0]  %s1431_s29, 64, %s2889_s4, [#allocation7]  }
 0x276   :  { %1817 = dma.done.wait [#allocation7], 64  }
 0x277   :  { %1818 = vsyncadd [#allocation7], 4294967232 }
 0x278   :  { %1437 = vsyncpa [#allocation7], 1 }

</bundles_post_ra>
